<compile_context>
chip_gen: v7x
topology: tpu7x:2x2x1
jax: 0.10.0
libtpu: 0.0.40
codegen_flags: <defaults>
</compile_context>

<pallas_src>
import jax
import jax.numpy as jnp
from jax.experimental import pallas as pl
from jax.experimental.pallas import tpu as pltpu


def banino_kernel(g_ref, w1_ref, b1_ref, w2_ref, b2_ref, mask_ref, out_ref):
    # linear1: bf16 MXU matmul with f32 accumulation, bias in f32.
    h1 = jnp.dot(g_ref[...], w1_ref[...], preferred_element_type=jnp.float32)
    h1 = h1 + b1_ref[...]

    # dropout(p=0.5) training semantics, fused: mask already holds 0.0 or 2.0.
    # Cast to bf16 in the same expression to feed the second MXU matmul.
    h1d = (h1 * mask_ref[...].astype(jnp.float32)).astype(jnp.bfloat16)

    # linear2: bf16 MXU matmul with f32 accumulation, bias in f32.
    out = jnp.dot(h1d, w2_ref[...], preferred_element_type=jnp.float32)
    out_ref[...] = (out + b2_ref[...]).astype(out_ref.dtype)


def _resident_spec(block_shape):
    """BlockSpec for operands that are identical on every grid step.

    Constant index map -> nothing to pipeline, so request a single buffer to
    free VMEM (W1 alone is 4 MiB bf16 at the real model size).  Falls back to
    the default (double-buffered) spec if pipeline_mode is unsupported.
    """
    index_map = lambda i: (0, 0)
    try:
        return pl.BlockSpec(block_shape, index_map, pipeline_mode=pl.Buffered(1))
    except (TypeError, AttributeError):
        return pl.BlockSpec(block_shape, index_map)


def banino_forward(g, w1_t, b1, w2_t, b2, dropout_mask, *, tm=256):
    """Forward pass of BaninoGridCells (training mode, dropout applied).

    g:            (M, G) float32    -- the learned `g` parameter
    w1_t:         (G, P) float32    -- linear1 weight, pre-transposed to (in, out)
    b1:           (1, P) float32
    w2_t:         (P, P) float32    -- linear2 weight, pre-transposed
    b2:           (1, P) float32
    dropout_mask: (M, P) float32    -- values in {0.0, 1/(1-p)}
    """
    M, G = g.shape
    P = w1_t.shape[1]

    # Pad the row dimension up to a multiple of the tile (real M=1000 -> 1024).
    m_pad = pl.cdiv(M, tm) * tm
    if m_pad != M:
        g = jnp.pad(g, ((0, m_pad - M), (0, 0)))
        dropout_mask = jnp.pad(dropout_mask, ((0, m_pad - M), (0, 0)))

    # bf16 operands for the MXU; biases stay f32 for the VPU adds.
    g_bf16 = g.astype(jnp.bfloat16)
    w1_bf16 = w1_t.astype(jnp.bfloat16)
    w2_bf16 = w2_t.astype(jnp.bfloat16)
    mask_bf16 = dropout_mask.astype(jnp.bfloat16)  # exactly representable {0, 2}
    b1_f32 = b1.astype(jnp.float32).reshape(1, P)
    b2_f32 = b2.astype(jnp.float32).reshape(1, P)

    out = pl.pallas_call(
        banino_kernel,
        out_shape=jax.ShapeDtypeStruct((m_pad, P), jnp.float32),
        grid=(m_pad // tm,),
        in_specs=[
            pl.BlockSpec((tm, G), lambda i: (i, 0)),   # g row tile
            _resident_spec((G, P)),                    # W1^T (resident)
            _resident_spec((1, P)),                    # b1   (resident)
            _resident_spec((P, P)),                    # W2^T (resident)
            _resident_spec((1, P)),                    # b2   (resident)
            pl.BlockSpec((tm, P), lambda i: (i, 0)),   # dropout mask row tile
        ],
        out_specs=pl.BlockSpec((tm, P), lambda i: (i, 0)),
        compiler_params=pltpu.CompilerParams(
            dimension_semantics=("parallel",),
            # Explicit scoped-VMEM budget: safe on v5e/v6e/v7x; total live VMEM
            # at the real 1000x4096x512 shapes with tm=256 is ~10-15 MiB.
            vmem_limit_bytes=32 * 1024 * 1024,
        ),
    )(g_bf16, w1_bf16, b1_f32, w2_bf16, b2_f32, mask_bf16)

    return out[:M]


def make_dropout_mask(key, shape, p=0.5):
    """Training-mode dropout mask, pre-scaled: {0.0, 1/(1-p)}."""
    keep = jax.random.bernoulli(key, 1.0 - p, shape)
    return keep.astype(jnp.float32) * (1.0 / (1.0 - p))


if __name__ == "__main__":
    # Small shapes consistent with the module (scaled down from 1000/4096/512).
    # M intentionally not a multiple of the tile, to exercise the padding path.
    num_spatial_positions = 500   # M
    num_grid_cells = 512          # G (linear1 in_features)
    num_place_cells = 256         # P (linear1 out / linear2 in+out)

    key = jax.random.PRNGKey(0)
    kg, kw1, kb1, kw2, kb2, kdrop = jax.random.split(key, 6)

    # Deterministic synthetic parameters.  (PyTorch inits g to zeros; we use
    # small random values so the compute path is exercised non-trivially.)
    g = jax.random.normal(kg, (num_spatial_positions, num_grid_cells),
                          dtype=jnp.float32) * 0.1
    # torch Linear weight is (out, in); pre-transposed here to (in, out).
    w1_t = jax.random.normal(kw1, (num_grid_cells, num_place_cells),
                             dtype=jnp.float32) * (1.0 / num_grid_cells ** 0.5)
    b1 = (jax.random.normal(kb1, (1, num_place_cells), dtype=jnp.float32)
          * (1.0 / num_grid_cells ** 0.5))
    w2_t = jax.random.normal(kw2, (num_place_cells, num_place_cells),
                             dtype=jnp.float32) * (1.0 / num_place_cells ** 0.5)
    b2 = (jax.random.normal(kb2, (1, num_place_cells), dtype=jnp.float32)
          * (1.0 / num_place_cells ** 0.5))

    # TODO(synk): dropout randomness comes from host-side jax.random (not the
    # on-chip PRNG), so it will never bit-match PyTorch's RNG stream.
    dropout_mask = make_dropout_mask(
        kdrop, (num_spatial_positions, num_place_cells), p=0.5)

    out = banino_forward(g, w1_t, b1, w2_t, b2, dropout_mask, tm=256)
    out = jax.block_until_ready(out)
    assert out.shape == (num_spatial_positions, num_place_cells)
    assert jnp.all(jnp.isfinite(out))
    print("KERNEL_OK")
</pallas_src>

<mosaic_0001>
module attributes {stable_mosaic.version = 11 : i64} {
  func.func @banino_kernel(%arg0: i32, %arg1: memref<256x512xbf16, #tpu.memory_space<vmem>>, %arg2: memref<512x256xbf16, #tpu.memory_space<vmem>>, %arg3: memref<1x256xf32, #tpu.memory_space<vmem>>, %arg4: memref<256x256xbf16, #tpu.memory_space<vmem>>, %arg5: memref<1x256xf32, #tpu.memory_space<vmem>>, %arg6: memref<256x256xbf16, #tpu.memory_space<vmem>>, %arg7: memref<256x256xf32, #tpu.memory_space<vmem>>) attributes {dimension_semantics = [#tpu.dimension_semantics<parallel>], iteration_bounds = array<i64: 2>, scalar_prefetch = 0 : i64, scratch_operands = 0 : i64, tpu.core_type = #tpu.core_type<tc>, window_params = [{transform_indices = @transform_0, window_bounds = array<i64: 256, 512>}, {pipeline_mode = #tpu.pipeline_mode<synchronous>, transform_indices = @transform_1, window_bounds = array<i64: 512, 256>}, {pipeline_mode = #tpu.pipeline_mode<synchronous>, transform_indices = @transform_2, window_bounds = array<i64: 1, 256>}, {pipeline_mode = #tpu.pipeline_mode<synchronous>, transform_indices = @transform_3, window_bounds = array<i64: 256, 256>}, {pipeline_mode = #tpu.pipeline_mode<synchronous>, transform_indices = @transform_4, window_bounds = array<i64: 1, 256>}, {transform_indices = @transform_5, window_bounds = array<i64: 256, 256>}, {transform_indices = @transform_6, window_bounds = array<i64: 256, 256>}]} {
    %c0 = arith.constant 0 : index
    %c0_0 = arith.constant 0 : index
    %0 = vector.load %arg1[%c0, %c0_0] : memref<256x512xbf16, #tpu.memory_space<vmem>>, vector<256x512xbf16>
    %c0_1 = arith.constant 0 : index
    %c0_2 = arith.constant 0 : index
    %1 = vector.load %arg2[%c0_1, %c0_2] : memref<512x256xbf16, #tpu.memory_space<vmem>>, vector<512x256xbf16>
    %cst = arith.constant dense<0.000000e+00> : vector<256x256xf32>
    %2 = tpu.matmul %0, %1, %cst {dimension_numbers = #tpu.dot_dimension_numbers<[1], [0], [0], [1], [0, 0, 1, 1], [], []>} : vector<256x512xbf16>, vector<512x256xbf16>, vector<256x256xf32> -> vector<256x256xf32>
    %c0_3 = arith.constant 0 : index
    %c0_4 = arith.constant 0 : index
    %3 = vector.load %arg3[%c0_3, %c0_4] : memref<1x256xf32, #tpu.memory_space<vmem>>, vector<1x256xf32>
    %4 = vector.broadcast %3 : vector<1x256xf32> to vector<256x256xf32>
    %5 = arith.addf %2, %4 : vector<256x256xf32>
    %c0_5 = arith.constant 0 : index
    %c0_6 = arith.constant 0 : index
    %6 = vector.load %arg6[%c0_5, %c0_6] : memref<256x256xbf16, #tpu.memory_space<vmem>>, vector<256x256xbf16>
    %7 = arith.extf %6 : vector<256x256xbf16> to vector<256x256xf32>
    %8 = arith.mulf %5, %7 : vector<256x256xf32>
    %9 = arith.truncf %8 : vector<256x256xf32> to vector<256x256xbf16>
    %c0_7 = arith.constant 0 : index
    %c0_8 = arith.constant 0 : index
    %10 = vector.load %arg4[%c0_7, %c0_8] : memref<256x256xbf16, #tpu.memory_space<vmem>>, vector<256x256xbf16>
    %cst_9 = arith.constant dense<0.000000e+00> : vector<256x256xf32>
    %11 = tpu.matmul %9, %10, %cst_9 {dimension_numbers = #tpu.dot_dimension_numbers<[1], [0], [0], [1], [0, 0, 1, 1], [], []>} : vector<256x256xbf16>, vector<256x256xbf16>, vector<256x256xf32> -> vector<256x256xf32>
    %c0_10 = arith.constant 0 : index
    %c0_11 = arith.constant 0 : index
    %12 = vector.load %arg5[%c0_10, %c0_11] : memref<1x256xf32, #tpu.memory_space<vmem>>, vector<1x256xf32>
    %13 = vector.broadcast %12 : vector<1x256xf32> to vector<256x256xf32>
    %14 = arith.addf %11, %13 : vector<256x256xf32>
    %c0_12 = arith.constant 0 : index
    %c0_13 = arith.constant 0 : index
    %15 = vector.load %arg7[%c0_12, %c0_13] : memref<256x256xf32, #tpu.memory_space<vmem>>, vector<256x256xf32>
    tpu.vector_store %arg7[%c0_12, %c0_13], %14 {strides = array<i32>} : memref<256x256xf32, #tpu.memory_space<vmem>>, vector<256x256xf32>,
    return
  }
  func.func @transform_0(%arg0: i32) -> (i32, i32) {
    %c0_i32 = arith.constant 0 : i32
    %c0_i32_0 = arith.constant 0 : i32
    return %arg0, %c0_i32 : i32, i32
  }
  func.func @transform_1(%arg0: i32) -> (i32, i32) {
    %c0_i32 = arith.constant 0 : i32
    %c0_i32_0 = arith.constant 0 : i32
    %c0_i32_1 = arith.constant 0 : i32
    return %c0_i32, %c0_i32_0 : i32, i32
  }
  func.func @transform_2(%arg0: i32) -> (i32, i32) {
    %c0_i32 = arith.constant 0 : i32
    %c0_i32_0 = arith.constant 0 : i32
    %c0_i32_1 = arith.constant 0 : i32
    return %c0_i32, %c0_i32_0 : i32, i32
  }
  func.func @transform_3(%arg0: i32) -> (i32, i32) {
    %c0_i32 = arith.constant 0 : i32
    %c0_i32_0 = arith.constant 0 : i32
    %c0_i32_1 = arith.constant 0 : i32
    return %c0_i32, %c0_i32_0 : i32, i32
  }
  func.func @transform_4(%arg0: i32) -> (i32, i32) {
    %c0_i32 = arith.constant 0 : i32
    %c0_i32_0 = arith.constant 0 : i32
    %c0_i32_1 = arith.constant 0 : i32
    return %c0_i32, %c0_i32_0 : i32, i32
  }
  func.func @transform_5(%arg0: i32) -> (i32, i32) {
    %c0_i32 = arith.constant 0 : i32
    %c0_i32_0 = arith.constant 0 : i32
    return %arg0, %c0_i32 : i32, i32
  }
  func.func @transform_6(%arg0: i32) -> (i32, i32) {
    %c0_i32 = arith.constant 0 : i32
    %c0_i32_0 = arith.constant 0 : i32
    return %arg0, %c0_i32 : i32, i32
  }
}

</mosaic_0001>

<bundles_post_ra>
// kernel: tpu_custom_call.1
= control target key start
LH: loop header
LB: loop body
LE: loop exit
PB: predicated region body
PF: predicated region fallthrough
CT: control target
= control target key end

     0   :  { %11 = vsyncpa [#allocation3], 0  ;;  %s3900_s0 = inlined_call_operand.hbm [shape: bf16[512,512], index: 0, kind: input, shape index: {}]   ;;  %s3901_s1 = inlined_call_operand.hbm [shape: bf16[512,256], index: 1, kind: input, shape index: {}]   ;;  %s3902_s2 = inlined_call_operand.vmem [shape: f32[1,256], index: 2, kind: input, shape index: {}]   ;;  %s3903_s3 = inlined_call_operand.hbm [shape: bf16[256,256], index: 3, kind: input, shape index: {}]   ;;  %s3904_s4 = inlined_call_operand.vmem [shape: f32[1,256], index: 4, kind: input, shape index: {}]   ;;  %s3905_s5 = inlined_call_operand.hbm [shape: bf16[512,256], index: 5, kind: input, shape index: {}]   ;;  %s3906_s6 = inlined_call_operand.hbm [shape: f32[512,256], index: 6, kind: output, shape index: {}]  }
   0x1   :  { %13 = vsyncpa [#allocation3 + $0x1], 0 }
   0x2   :  { %14 = vsyncpa [#allocation6], 0 }
   0x3   :  { %15 = vsyncpa [#allocation9], 0 }
   0x4   :  { %17 = vsyncpa [#allocation9 + $0x1], 0 }
   0x5   :  { %18 = vsyncpa [#allocation4], 0 }
   0x6   :  { %20 = vsyncpa [#allocation4 + $0x1], 0  ;;  %s3200_s21 = smov 0   ;;  %s3202_s22 = smov 0  }
   0x7   :  { %s3204_s23 = smov 0   ;;  %s3206_s24 = smov 0  }
   0x8 LB: > { %s3221_s25 = sadd.s32 4294967295, %s3152_s24   ;;  %s2293_s26 = sadd.s32 4294967294, %s3152_s24   ;;  %s3152_s24 = sphi %s3206_s24, %s3938_s24   ;;  %s3148_s23 = sphi %s3204_s23, %s3942_s23   ;;  %s3144_s22 = sphi %s3202_s22, %s3941_s22   ;;  %s3140_s21 = sphi %s3200_s21, %s3940_s21  }
   0x9   : > { %s3225_s27 = sadd.s32 1, %s3152_s24   ;;  %s33_s28 = sadd.s32 1, %s3148_s23 }
   0xa   : > { %3916 = sst [smem:[#allocation15_spill]] %s3225_s27  ;;  %s30_s29 = ssub.s32 %s3152_s24, %s3225_s27 }
   0xb   : > { %p40_p0 = scmp.ne.s32.totalorder %s3148_s23, %s3144_s22  ;;  %p31_p1 = scmp.eq.s32.totalorder %s30_s29, 0 }
   0xc   : > { %p41_p2 = scmp.eq.s32.totalorder %s3152_s24, 0  ;;  %p46_p3 = scmp.ne.s32.totalorder %s3144_s22, %s3140_s21 }
   0xd   : > { %p3907_p4 = scmp.eq.s32.totalorder %s3221_s25, 0  ;;  %p180_p7 = scmp.eq.s32.totalorder %s3221_s25, 1 }
   0xe   : > { %s3237_s30 = scalar_select %p31_p1, %s3148_s23, %s33_s28  }
   0xf   : > { %p3239_p5 = por %p41_p2, %p40_p0  ;;  %p3245_p6 = por %p3907_p4, %p46_p3 }
  0x10   : > { %3917 = sst [smem:[#allocation16_spill]] %s3237_s30  ;;  %p186_p8 = scmp.eq.s32.totalorder %s2293_s26, 1 }
  0x11   : > { %s3918_s7 = scalar_select %p3239_p5, 1, 0 }
  0x12   : > { %s3919_s8 = scalar_select %p3245_p6, 1, 0 }
  0x13   : > { %p2294_p9 = scmp.ge.s32.totalorder %s3152_s24, 1  ;;  %p193_p10 = scmp.lt.s32.totalorder %s3152_s24, 3 }
  0x14   : > { %p3252_p11 = por %p180_p7, %p40_p0  ;;  %p3256_p12 = por %p186_p8, %p46_p3 }
  0x15   : > { %p3260_p13 = pnand %p2294_p9, %p193_p10  ;;  %s3154_s12 = smov [#allocation5]  }
  0x16   : > { %s3920_s9 = scalar_select %p3252_p11, 1, 0 }
  0x17   : > { %s3921_s10 = scalar_select %p3256_p12, 1, 0 }
  0x18   : > { %s3923_s11 = scalar_select %p3260_p13, 1, 0 }
  0x19   : > { %3922 = sst [smem:[#allocation17_spill]] %s3921_s10  ;;  %p2658_p1 = pneg %p3260_p13 }
  0x1a   : > { %s205_s13 = sshll.u32 %s3154_s12, 4  ;;  %s3155_s15 = smov [#allocation7]   ;;  %s206_s13 = int_to_ptr.vmem [resolvable:$true] %s205_s13 }
  0x1b   : > { %p3268_p2 = pnand %p2658_p1, %p3907_p4  ;;  %s221_s16 = sshll.u32 %s3155_s15, 4  ;;  %s222_s16 = int_to_ptr.vmem [resolvable:$true] %s221_s16 }
  0x1c   : > { %s2962_s19 = scalar_lea.hbm %s3901_s1, 8192 }
  0x1d   : > { %p2963_p7 = scmp.ne.s32.totalorder %s3901_s1, %s2962_s19  ;;  %p2964_p8 = pneg %p3268_p2 }
  0x1e   : > { %p2969_p1 = scmp.lt.u32.totalorder %s2962_s19, %s3901_s1 }
  0x1f   : > { %p2965_p9 = pnand %p2964_p8, %p2963_p7 }
  0x21   : > { %p2966_p10 = pneg %p2965_p9 }
  0x23   : > { %p2971_p0 = pnand %p2969_p1, %p2966_p10 }
  0x25   : > { %2974 = shalt.err (!%p2971_p0)
}
  0x26   : > { %s2975_s12 = scalar_lea.vmem %s206_s13, 8192  ;;  %p2983_p11 = scmp.lt.s32.totalorder %s206_s13, %s206_s13 }
  0x27   : > { %p2976_p4 = scmp.ne.s32.totalorder %s206_s13, %s2975_s12  ;;  %p2984_p6 = scmp.lt.s32.totalorder %s2975_s12, %s2975_s12 }
  0x29   : > { %p2978_p3 = pnand %p2976_p4, %p2964_p8  ;;  %p2985_p13 = por %p2984_p6, %p2983_p11 }
  0x2b   : > { %p2979_p12 = pneg %p2978_p3 }
  0x2d   : > { %p2986_p5 = pnand %p2985_p13, %p2979_p12 }
  0x2f   : > { %2989 = shalt.err (!%p2986_p5)
}
  0x30   : > { %s3914_s15 = smov 128   ;;  %s3915_s17 = smov 8  }
  0x31   : > { %2661 = dma.hbm_to_vmem [thread:$0]  (!%p3268_p2), %s3901_s1, 8192, %s206_s13, [#allocation6], %s3914_s15, %s3914_s15, %s3915_s17  }
  0x32   : > { %s3300_s20 = sand.u32 1, %s3148_s23   ;;  %s2990_s29 = scalar_lea.hbm %s3903_s3, 4096 }
  0x33   : > { %p2991_p4 = scmp.ne.s32.totalorder %s3903_s3, %s2990_s29  ;;  %p2997_p11 = scmp.lt.u32.totalorder %s2990_s29, %s3903_s3 }
  0x35   : > { %p2993_p5 = pnand %p2991_p4, %p2964_p8 }
  0x37   : > { %p2994_p6 = pneg %p2993_p5 }
  0x39   : > { %p2999_p12 = pnand %p2997_p11, %p2994_p6 }
  0x3b   : > { %3002 = shalt.err (!%p2999_p12)
}
  0x3c   : > { %s3003_s13 = scalar_lea.vmem %s222_s16, 4096  ;;  %p3011_p7 = scmp.lt.s32.totalorder %s222_s16, %s222_s16 }
  0x3d   : > { %p3004_p13 = scmp.ne.s32.totalorder %s222_s16, %s3003_s13  ;;  %p3012_p9 = scmp.lt.s32.totalorder %s3003_s13, %s3003_s13 }
  0x3f   : > { %p3006_p0 = pnand %p3004_p13, %p2964_p8  ;;  %p3013_p10 = por %p3012_p9, %p3011_p7 }
  0x41   : > { %p3007_p3 = pneg %p3006_p0 }
  0x43   : > { %p3014_p1 = pnand %p3013_p10, %p3007_p3 }
  0x45   : > { %3017 = shalt.err (!%p3014_p1)
}
  0x46   : > { %2664 = dma.hbm_to_vmem [thread:$0]  (!%p3268_p2), %s3903_s3, 4096, %s222_s16, [#allocation6], %s3914_s15, %s3914_s15, %s3915_s17  }
  0x47   : > { %s2298_s10 = sshll.u32 %s3300_s20, 9  ;;  %s2479_s18 = sshll.u32 %s3152_s24, 13 }
  0x48   : > { %s3330_s28 = scalar_lea.hbm %s3900_s0, %s2479_s18  ;;  %s242_s14 = scalar_lea.vmem [#allocation2], %s2298_s10 }
  0x49   : > { %s250_s29 = sshll.u32 %s242_s14, 4  ;;  %p3925_p8 = scmp.ne.s32.totalorder %s3918_s7, 0  ;;  %s3332_s29 = int_to_ptr.vmem [resolvable:$true] %s250_s29 }
  0x4a   : > { %p3926_p4 = scmp.lt.s32.totalorder %s3152_s24, 2  ;;  %s239_s16 = scalar_lea.sflag [#allocation3], %s3300_s20 }
  0x4b   : > { %s3018_s13 = scalar_lea.hbm %s3330_s28, 8192  ;;  %s3023_s7 = scalar_lea.hbm %s3900_s0, 16384 }
  0x4c   : > { %p3338_p5 = pnand %p3926_p4, %p3925_p8  ;;  %p3019_p2 = scmp.ne.s32.totalorder %s3330_s28, %s3018_s13 }
  0x4d   : > { %p3024_p13 = scmp.lt.u32.totalorder %s3330_s28, %s3900_s0  ;;  %p3025_p0 = scmp.lt.u32.totalorder %s3023_s7, %s3018_s13 }
  0x4e   : > { %p3020_p6 = pneg %p3338_p5  ;;  %p3027_p7 = scmp.lt.u32.totalorder %s3018_s13, %s3330_s28 }
  0x4f   : > { %p3026_p3 = por %p3025_p0, %p3024_p13 }
  0x50   : > { %p3021_p11 = pnand %p3020_p6, %p3019_p2 }
  0x51   : > { %p3028_p9 = por %p3027_p7, %p3026_p3 }
  0x52   : > { %p3022_p12 = pneg %p3021_p11 }
  0x54   : > { %p3029_p10 = pnand %p3028_p9, %p3022_p12 }
  0x56   : > { %3032 = shalt.err (!%p3029_p10)
}
  0x57   : > { %s3033_s19 = scalar_lea.vmem %s3332_s29, 8192  ;;  %s3158_s26 = smov [#allocation2]  }
  0x58   : > { %p3034_p1 = scmp.ne.s32.totalorder %s3332_s29, %s3033_s19  ;;  %s3038_s14 = sshll.u32 %s3158_s26, 4  ;;  %s3039_s14 = int_to_ptr.vmem [resolvable:$false] %s3038_s14 }
  0x59   : > { %s3040_s27 = scalar_lea.vmem %s3039_s14, 16384  ;;  %p3041_p2 = scmp.lt.s32.totalorder %s3332_s29, %s3039_s14 }
  0x5a   : > { %p3036_p8 = pnand %p3034_p1, %p3020_p6  ;;  %p3042_p11 = scmp.lt.s32.totalorder %s3040_s27, %s3033_s19 }
  0x5c   : > { %p3037_p4 = pneg %p3036_p8  ;;  %p3043_p13 = por %p3042_p11, %p3041_p2 }
  0x5e   : > { %p3044_p0 = pnand %p3043_p13, %p3037_p4 }
  0x60   : > { %3047 = shalt.err (!%p3044_p0)
}
  0x61   : > { %s3159_s13 = smov 256   ;;  %s3160_s30 = smov 16  }
  0x62   : > { %2668 = dma.hbm_to_vmem [thread:$0]  (!%p3338_p5), %s3330_s28, 8192, %s3332_s29, %s239_s16, %s3159_s13, %s3159_s13, %s3160_s30  }
  0x63   : > { %s2302_s7 = sshll.u32 %s3300_s20, 8  ;;  %s2481_s10 = sshll.u32 %s3152_s24, 12 }
  0x64   : > { %s3375_s26 = scalar_lea.hbm %s3905_s5, %s2481_s10  ;;  %s264_s14 = scalar_lea.vmem [#allocation8], %s2302_s7 }
  0x65   : > { %s272_s27 = sshll.u32 %s264_s14, 4  ;;  %s261_s15 = scalar_lea.sflag [#allocation9], %s3300_s20  ;;  %s3377_s27 = int_to_ptr.vmem [resolvable:$true] %s272_s27 }
  0x66   : > { %s3048_s17 = scalar_lea.hbm %s3375_s26, 4096  ;;  %s3053_s16 = scalar_lea.hbm %s3905_s5, 8192 }
  0x67   : > { %p3049_p12 = scmp.ne.s32.totalorder %s3375_s26, %s3048_s17  ;;  %p3054_p9 = scmp.lt.u32.totalorder %s3375_s26, %s3905_s5 }
  0x68   : > { %p3055_p10 = scmp.lt.u32.totalorder %s3053_s16, %s3048_s17  ;;  %p3057_p8 = scmp.lt.u32.totalorder %s3048_s17, %s3375_s26 }
  0x69   : > { %p3051_p3 = pnand %p3049_p12, %p3020_p6 }
  0x6a   : > { %p3056_p1 = por %p3055_p10, %p3054_p9 }
  0x6b   : > { %p3052_p7 = pneg %p3051_p3 }
  0x6c   : > { %p3058_p4 = por %p3057_p8, %p3056_p1 }
  0x6e   : > { %p3059_p2 = pnand %p3058_p4, %p3052_p7 }
  0x70   : > { %3062 = shalt.err (!%p3059_p2)
}
  0x71   : > { %s3063_s7 = scalar_lea.vmem %s3377_s27, 4096  ;;  %s3161_s10 = smov [#allocation8]  }
  0x72   : > { %p3064_p11 = scmp.ne.s32.totalorder %s3377_s27, %s3063_s7  ;;  %s3068_s18 = sshll.u32 %s3161_s10, 4  ;;  %s3069_s18 = int_to_ptr.vmem [resolvable:$false] %s3068_s18 }
  0x73   : > { %s3070_s19 = scalar_lea.vmem %s3069_s18, 8192  ;;  %p3071_p12 = scmp.lt.s32.totalorder %s3377_s27, %s3069_s18 }
  0x74   : > { %p3066_p13 = pnand %p3064_p11, %p3020_p6  ;;  %p3072_p3 = scmp.lt.s32.totalorder %s3070_s19, %s3063_s7 }
  0x76   : > { %p3067_p0 = pneg %p3066_p13  ;;  %p3073_p9 = por %p3072_p3, %p3071_p12 }
  0x78   : > { %p3074_p10 = pnand %p3073_p9, %p3067_p0 }
  0x7a   : > { %3077 = shalt.err (!%p3074_p10)
}
  0x7b   : > { %s3928_s17 = smov 8   ;;  %s3929_s14 = smov 128  }
  0x7c   : > { %2671 = dma.hbm_to_vmem [thread:$0]  (!%p3338_p5), %s3375_s26, 4096, %s3377_s27, %s261_s15, %s3929_s14, %s3929_s14, %s3928_s17  }
  0x7d   : > { %p3930_p6 = scmp.ne.s32.totalorder %s3923_s11, 0 }
  0x7e   : > { %s3411_s28 = sand.u32 (!%p3930_p6), 1, %s3144_s22   ;;  %p3931_p7 = scmp.ne.s32.totalorder (!%p3930_p6), %s3919_s8, 0 }
  0x7f   : > { %284 = sbr.rel (%p3930_p6) target bundleno = 844 (0x34c), region = 44  ;;  %s2307_s29 = sshll.u32 (!%p3930_p6), %s3411_s28, 9 }
  0x80   : > { %s287_s12 = scalar_lea.sflag (!%p3930_p6), [#allocation3], %s3411_s28  ;;  %s3417_s16 = scalar_lea.vmem (!%p3930_p6), [#allocation2], %s2307_s29 }
  0x86   : > { %3123 = dma.done.wait (%p3931_p7), %s287_s12, 8192  }
  0x87   : > { %3125 = vsyncadd (%p3931_p7), %s287_s12, 4294959104  ;;  %p3932_p5 = scmp.eq.s32.totalorder %s3221_s25, 0 }
  0x89   : > { %3127 = dma.done.wait (%p3932_p5), [#allocation6], 12288   ;;  %p3933_p1 = pmov %p3932_p5 }
  0x8a   : > { %s2310_s11 = sshll.u32 %s3411_s28, 8  ;;  %s304_s15 = scalar_lea.sflag [#allocation9], %s3411_s28 }
  0x8b   : > { %3129 = vsyncadd (%p3933_p1), [#allocation6], 4294955008  ;;  %s3429_s20 = scalar_lea.vmem [#allocation8], %s2310_s11 }
  0x8c   : > { %3131 = dma.done.wait (%p3931_p7), %s304_s15, 4096  }
  0x8d   : > { %3133 = vsyncadd (%p3931_p7), %s304_s15, 4294963200  ;;  %v2722_v0 = vld [vmem:[#allocation5 + $0x4] ss:$8 sps:$4 sm:$0xff]   ;;  %v2724_v1 = vld [vmem:[#allocation5] ss:$8 sps:$4 sm:$0xff]   ;;  %s3721_s30 = scalar_lea.vmem [#allocation10], %s2307_s29 }
  0x8e   : > { %1124 = vmatprep.subr.bf16.mxu0 %v2722_v0  ;;  %v2725_v2 = vld [vmem:[#allocation5 + $0x14] ss:$8 sps:$4 sm:$0xff]   ;;  %2484 = vmatprep.subr.bf16.mxu1 %v2722_v0  ;;  %v2727_v3 = vld [vmem:[#allocation5 + $0x10] ss:$8 sps:$4 sm:$0xff]   ;;  %v2728_v4 = vld [vmem:[#allocation5 + $0x24] ss:$8 sps:$4 sm:$0xff]  }
  0x8f   : > { %1125 = vmatpush1.bf16.msra.mxu0 %v2724_v1  ;;  %2500 = vmatpush1.bf16.msra.mxu1 %v2724_v1  ;;  %v2730_v5 = vld [vmem:[#allocation5 + $0x20] ss:$8 sps:$4 sm:$0xff]   ;;  %v2731_v6 = vld [vmem:[#allocation5 + $0x34] ss:$8 sps:$4 sm:$0xff]   ;;  %v2733_v7 = vld [vmem:[#allocation5 + $0x30] ss:$8 sps:$4 sm:$0xff]  }
  0x90   : > { %1126 = vmatprep.subr.bf16.mxu0 %v2725_v2  ;;  %2485 = vmatprep.subr.bf16.mxu1 %v2725_v2  ;;  %v2734_v8 = vld [vmem:[#allocation5 + $0x44] ss:$8 sps:$4 sm:$0xff]   ;;  %v2736_v9 = vld [vmem:[#allocation5 + $0x40] ss:$8 sps:$4 sm:$0xff]   ;;  %v2737_v10 = vld [vmem:[#allocation5 + $0x54] ss:$8 sps:$4 sm:$0xff]  }
  0x91   : > { %v2739_v11 = vld [vmem:[#allocation5 + $0x50] ss:$8 sps:$4 sm:$0xff]   ;;  %v2740_v12 = vld [vmem:[#allocation5 + $0x64] ss:$8 sps:$4 sm:$0xff]   ;;  %v2742_v14 = vld [vmem:[#allocation5 + $0x60] ss:$8 sps:$4 sm:$0xff]  }
  0x92   : > { %v2772_v13 = vld [vmem:[%s3417_s16 + $0x4] ss:$16 sps:$4 sm:$0xff]   ;;  %v2745_v16 = vld [vmem:[#allocation5 + $0x70] ss:$8 sps:$4 sm:$0xff]   ;;  %v2748_v18 = vld [vmem:[#allocation5 + $0x80] ss:$8 sps:$4 sm:$0xff]  }
  0x93   : > { %1127 = vmatpush1.bf16.msra.mxu0 %v2727_v3  ;;  %2501 = vmatpush1.bf16.msra.mxu1 %v2727_v3  ;;  %v2743_v15 = vld [vmem:[#allocation5 + $0x74] ss:$8 sps:$4 sm:$0xff]   ;;  %v2746_v17 = vld [vmem:[#allocation5 + $0x84] ss:$8 sps:$4 sm:$0xff]   ;;  %v2751_v20 = vld [vmem:[#allocation5 + $0x90] ss:$8 sps:$4 sm:$0xff]  }
  0x94   : > { %1128 = vmatprep.subr.bf16.mxu0 %v2728_v4  ;;  %2486 = vmatprep.subr.bf16.mxu1 %v2728_v4  ;;  %v2749_v19 = vld [vmem:[#allocation5 + $0x94] ss:$8 sps:$4 sm:$0xff]   ;;  %v2752_v21 = vld [vmem:[#allocation5 + $0xa4] ss:$8 sps:$4 sm:$0xff]   ;;  %v2754_v22 = vld [vmem:[#allocation5 + $0xa0] ss:$8 sps:$4 sm:$0xff]  }
  0x95   : > { %1156 = vmatprep.mubr.bf16.mxu0 %v2772_v13  ;;  %v2755_v23 = vld [vmem:[#allocation5 + $0xb4] ss:$8 sps:$4 sm:$0xff]   ;;  %v2757_v24 = vld [vmem:[#allocation5 + $0xb0] ss:$8 sps:$4 sm:$0xff]   ;;  %v2758_v25 = vld [vmem:[#allocation5 + $0xc4] ss:$8 sps:$4 sm:$0xff]  }
  0x96   : > { %v2760_v26 = vld [vmem:[#allocation5 + $0xc0] ss:$8 sps:$4 sm:$0xff]   ;;  %v2761_v27 = vld [vmem:[#allocation5 + $0xd4] ss:$8 sps:$4 sm:$0xff]   ;;  %v2763_v28 = vld [vmem:[#allocation5 + $0xd0] ss:$8 sps:$4 sm:$0xff]  }
  0x97   : > { %1129 = vmatpush1.bf16.msra.mxu0 %v2730_v5  ;;  %2502 = vmatpush1.bf16.msra.mxu1 %v2730_v5  ;;  %v2764_v29 = vld [vmem:[#allocation5 + $0xe4] ss:$8 sps:$4 sm:$0xff]   ;;  %v2766_v30 = vld [vmem:[#allocation5 + $0xe0] ss:$8 sps:$4 sm:$0xff]   ;;  %v2767_v31 = vld [vmem:[#allocation5 + $0xf4] ss:$8 sps:$4 sm:$0xff]  }
  0x98   : > { %1130 = vmatprep.subr.bf16.mxu0 %v2731_v6  ;;  %2487 = vmatprep.subr.bf16.mxu1 %v2731_v6  ;;  %v2769_v32 = vld [vmem:[#allocation5 + $0xf0] ss:$8 sps:$4 sm:$0xff]   ;;  %v2775_v33 = vld [vmem:[#allocation5 + $0x104] ss:$8 sps:$4 sm:$0xff]   ;;  %v2773_v35 = vld [vmem:[#allocation5 + $0x100] ss:$8 sps:$4 sm:$0xff]  }
  0x99   : > { %v2770_v34 = vld [vmem:[%s3417_s16] ss:$16 sps:$4 sm:$0xff]   ;;  %v2778_v36 = vld [vmem:[#allocation5 + $0x114] ss:$8 sps:$4 sm:$0xff]   ;;  %v2784_v43 = vld [vmem:[#allocation5 + $0x124] ss:$8 sps:$4 sm:$0xff]  }
  0x9a   : > { %v2779_v37 = vld [vmem:[%s3417_s16 + $0x24] ss:$16 sps:$4 sm:$0xff]   ;;  %v2866_v38 = vld [vmem:[%s3417_s16 + $0x100] ss:$16 sps:$4 sm:$0xff]   ;;  %s2483_s7 = sshll.u32 %s3221_s25, 13  ;;  %s2178_s10 = sshll.u32 %s3721_s30, 4  ;;  %s3852_s10 = int_to_ptr.vmem [resolvable:$true] %s2178_s10 }
  0x9b   : > { %1131 = vmatpush1.bf16.msra.mxu0 %v2733_v7  ;;  %2503 = vmatpush1.bf16.msra.mxu1 %v2733_v7  ;;  %v2868_v39 = vld [vmem:[%s3417_s16 + $0x104] ss:$16 sps:$4 sm:$0xff]   ;;  %v2776_v40 = vld [vmem:[#allocation5 + $0x110] ss:$8 sps:$4 sm:$0xff]   ;;  %v2782_v44 = vld [vmem:[#allocation5 + $0x120] ss:$8 sps:$4 sm:$0xff]   ;;  %s3850_s17 = scalar_lea.hbm %s3906_s6, %s2483_s7 }
  0x9c   : > { %1132 = vmatprep.subr.bf16.mxu0 %v2734_v8  ;;  %2488 = vmatprep.subr.bf16.mxu1 %v2734_v8  ;;  %v2872_v41 = vld [vmem:[%s3417_s16 + $0x124] ss:$16 sps:$4 sm:$0xff]   ;;  %v2781_v42 = vld [vmem:[%s3417_s16 + $0x20] ss:$16 sps:$4 sm:$0xff]   ;;  %s2164_s25 = scalar_lea.sflag [#allocation4], %s3411_s28  ;;  %s3078_s14 = scalar_lea.vmem %s3852_s10, 8192 }
  0x9d   : > { %1236 = vmatprep.mubr.bf16.mxu1 %v2868_v39  ;;  %v2788_v45 = vld [vmem:[%s3417_s16 + $0x44] ss:$16 sps:$4 sm:$0xff]   ;;  %v2874_v47 = vld [vmem:[%s3417_s16 + $0x120] ss:$16 sps:$4 sm:$0xff]   ;;  %p3079_p8 = scmp.ne.s32.totalorder %s3852_s10, %s3078_s14  ;;  %p3934_p4 = scmp.ne.s32.totalorder %s3920_s9, 0 }
  0x9e   : > { %v2787_v46 = vld [vmem:[#allocation5 + $0x134] ss:$8 sps:$4 sm:$0xff]   ;;  %v2785_v48 = vld [vmem:[#allocation5 + $0x130] ss:$8 sps:$4 sm:$0xff]   ;;  %v2793_v50 = vld [vmem:[#allocation5 + $0x144] ss:$8 sps:$4 sm:$0xff]  }
  0x9f   : > { %1133 = vmatpush1.bf16.msra.mxu0 %v2736_v9  ;;  %2504 = vmatpush1.bf16.msra.mxu1 %v2736_v9  ;;  %v2878_v49 = vld [vmem:[%s3417_s16 + $0x144] ss:$16 sps:$4 sm:$0xff]   ;;  %v2790_v51 = vld [vmem:[%s3417_s16 + $0x40] ss:$16 sps:$4 sm:$0xff]   ;;  %p3080_p2 = pnand %p3079_p8, %p3934_p4  ;;  %s3162_s29 = smov [#allocation10]  }
  0xa0   : > { %1134 = vmatprep.subr.bf16.mxu0 %v2737_v10  ;;  %2489 = vmatprep.subr.bf16.mxu1 %v2737_v10  ;;  %v2791_v52 = vld [vmem:[#allocation5 + $0x140] ss:$8 sps:$4 sm:$0xff]   ;;  %v2797_v53 = vld [vmem:[%s3417_s16 + $0x64] ss:$16 sps:$4 sm:$0xff]   ;;  %v2794_v56 = vld [vmem:[#allocation5 + $0x150] ss:$8 sps:$4 sm:$0xff]  }
  0xa1   : > { %v2796_v54 = vld [vmem:[#allocation5 + $0x154] ss:$8 sps:$4 sm:$0xff]   ;;  %v2880_v55 = vld [vmem:[%s3417_s16 + $0x140] ss:$16 sps:$4 sm:$0xff]   ;;  %v2802_v58 = vld [vmem:[#allocation5 + $0x164] ss:$8 sps:$4 sm:$0xff]   ;;  %p3081_p11 = pneg %p3080_p2 }
  0xa2   : > { %v2884_v57 = vld [vmem:[%s3417_s16 + $0x164] ss:$16 sps:$4 sm:$0xff]   ;;  %v2799_v59 = vld [vmem:[%s3417_s16 + $0x60] ss:$16 sps:$4 sm:$0xff]   ;;  %s3082_s12 = sshll.u32 %s3162_s29, 4  ;;  %s3083_s12 = int_to_ptr.vmem [resolvable:$false] %s3082_s12 }
  0xa3   : > { %1135 = vmatpush1.bf16.msra.mxu0 %v2739_v11  ;;  %2505 = vmatpush1.bf16.msra.mxu1 %v2739_v11  ;;  %v2800_v60 = vld [vmem:[#allocation5 + $0x160] ss:$8 sps:$4 sm:$0xff]   ;;  %v2806_v61 = vld [vmem:[%s3417_s16 + $0x84] ss:$16 sps:$4 sm:$0xff]   ;;  %v2803_v1 = vld [vmem:[#allocation5 + $0x170] ss:$8 sps:$4 sm:$0xff]   ;;  %p3085_p13 = scmp.lt.s32.totalorder %s3852_s10, %s3083_s12 }
  0xa4   : > { %1136 = vmatprep.subr.bf16.mxu0 %v2740_v12  ;;  %2490 = vmatprep.subr.bf16.mxu1 %v2740_v12  ;;  %v2805_v62 = vld [vmem:[#allocation5 + $0x174] ss:$8 sps:$4 sm:$0xff]   ;;  %v2886_v63 = vld [vmem:[%s3417_s16 + $0x160] ss:$16 sps:$4 sm:$0xff]   ;;  %v2811_v2 = vld [vmem:[#allocation5 + $0x184] ss:$8 sps:$4 sm:$0xff]  }
  0xa5   : > { %v2890_v0 = vld [vmem:[%s3417_s16 + $0x184] ss:$16 sps:$4 sm:$0xff]   ;;  %v2808_v3 = vld [vmem:[%s3417_s16 + $0x80] ss:$16 sps:$4 sm:$0xff]  }
  0xa6   : > { %v2809_v4 = vld [vmem:[#allocation5 + $0x180] ss:$8 sps:$4 sm:$0xff]   ;;  %v2815_v5 = vld [vmem:[%s3417_s16 + $0xa4] ss:$16 sps:$4 sm:$0xff]   ;;  %v2812_v9 = vld [vmem:[#allocation5 + $0x190] ss:$8 sps:$4 sm:$0xff]  }
  0xa7   : > { %1137 = vmatpush1.bf16.msra.mxu0 %v2742_v14  ;;  %2506 = vmatpush1.bf16.msra.mxu1 %v2742_v14  ;;  %v2814_v6 = vld [vmem:[#allocation5 + $0x194] ss:$8 sps:$4 sm:$0xff]   ;;  %v2892_v7 = vld [vmem:[%s3417_s16 + $0x180] ss:$16 sps:$4 sm:$0xff]   ;;  %v2820_v10 = vld [vmem:[#allocation5 + $0x1a4] ss:$8 sps:$4 sm:$0xff]  }
  0xa8   : > { %1138 = vmatprep.subr.bf16.mxu0 %v2743_v15  ;;  %2491 = vmatprep.subr.bf16.mxu1 %v2743_v15  ;;  %v2896_v8 = vld [vmem:[%s3417_s16 + $0x1a4] ss:$16 sps:$4 sm:$0xff]   ;;  %v2817_v11 = vld [vmem:[%s3417_s16 + $0xa0] ss:$16 sps:$4 sm:$0xff]  }
  0xa9   : > { %v2818_v12 = vld [vmem:[#allocation5 + $0x1a0] ss:$8 sps:$4 sm:$0xff]   ;;  %v2824_v13 = vld [vmem:[%s3417_s16 + $0xc4] ss:$16 sps:$4 sm:$0xff]  }
  0xaa   : > { %v2823_v14 = vld [vmem:[#allocation5 + $0x1b4] ss:$8 sps:$4 sm:$0xff]   ;;  %v2898_v15 = vld [vmem:[%s3417_s16 + $0x1a0] ss:$16 sps:$4 sm:$0xff]   ;;  %v2922_v39 = vld [vmem:[#allocation7 + $0x24] ss:$8 sps:$4 sm:$0xff]  }
  0xab   : > { %1139 = vmatpush1.bf16.msra.mxu0 %v2745_v16  ;;  %2507 = vmatpush1.bf16.msra.mxu1 %v2745_v16  ;;  %v2902_v16 = vld [vmem:[%s3417_s16 + $0x1c4] ss:$16 sps:$4 sm:$0xff]  }
  0xac   : > { %1140 = vmatprep.subr.bf16.mxu0 %v2746_v17  ;;  %2492 = vmatprep.subr.bf16.mxu1 %v2746_v17  ;;  %v2821_v17 = vld [vmem:[#allocation5 + $0x1b0] ss:$8 sps:$4 sm:$0xff]  }
  0xaf   : > { %1141 = vmatpush1.bf16.msra.mxu0 %v2748_v18  ;;  %2508 = vmatpush1.bf16.msra.mxu1 %v2748_v18  ;;  %v2829_v18 = vld [vmem:[#allocation5 + $0x1c4] ss:$8 sps:$4 sm:$0xff]  }
  0xb0   : > { %1142 = vmatprep.subr.bf16.mxu0 %v2749_v19  ;;  %2493 = vmatprep.subr.bf16.mxu1 %v2749_v19  ;;  %v2826_v19 = vld [vmem:[%s3417_s16 + $0xc0] ss:$16 sps:$4 sm:$0xff]  }
  0xb3   : > { %1143 = vmatpush1.bf16.msra.mxu0 %v2751_v20  ;;  %2509 = vmatpush1.bf16.msra.mxu1 %v2751_v20  ;;  %v2827_v20 = vld [vmem:[#allocation5 + $0x1c0] ss:$8 sps:$4 sm:$0xff]  }
  0xb4   : > { %1144 = vmatprep.subr.bf16.mxu0 %v2752_v21  ;;  %2494 = vmatprep.subr.bf16.mxu1 %v2752_v21  ;;  %v2833_v21 = vld [vmem:[%s3417_s16 + $0xe4] ss:$16 sps:$4 sm:$0xff]  }
  0xb7   : > { %1145 = vmatpush1.bf16.msra.mxu0 %v2754_v22  ;;  %2510 = vmatpush1.bf16.msra.mxu1 %v2754_v22  ;;  %v2832_v22 = vld [vmem:[#allocation5 + $0x1d4] ss:$8 sps:$4 sm:$0xff]  }
  0xb8   : > { %1146 = vmatprep.subr.bf16.mxu0 %v2755_v23  ;;  %2495 = vmatprep.subr.bf16.mxu1 %v2755_v23  ;;  %v2904_v23 = vld [vmem:[%s3417_s16 + $0x1c0] ss:$16 sps:$4 sm:$0xff]  }
  0xbb   : > { %1147 = vmatpush1.bf16.msra.mxu0 %v2757_v24  ;;  %2511 = vmatpush1.bf16.msra.mxu1 %v2757_v24  ;;  %v2908_v24 = vld [vmem:[%s3417_s16 + $0x1e4] ss:$16 sps:$4 sm:$0xff]  }
  0xbc   : > { %1148 = vmatprep.subr.bf16.mxu0 %v2758_v25  ;;  %2496 = vmatprep.subr.bf16.mxu1 %v2758_v25  ;;  %v2830_v25 = vld [vmem:[#allocation5 + $0x1d0] ss:$8 sps:$4 sm:$0xff]  }
  0xbf   : > { %1149 = vmatpush1.bf16.msra.mxu0 %v2760_v26  ;;  %2512 = vmatpush1.bf16.msra.mxu1 %v2760_v26  ;;  %v2838_v26 = vld [vmem:[#allocation5 + $0x1e4] ss:$8 sps:$4 sm:$0xff]  }
  0xc0   : > { %1150 = vmatprep.subr.bf16.mxu0 %v2761_v27  ;;  %2497 = vmatprep.subr.bf16.mxu1 %v2761_v27  ;;  %v2835_v27 = vld [vmem:[%s3417_s16 + $0xe0] ss:$16 sps:$4 sm:$0xff]  }
  0xc3   : > { %1151 = vmatpush1.bf16.msra.mxu0 %v2763_v28  ;;  %2513 = vmatpush1.bf16.msra.mxu1 %v2763_v28  ;;  %v2836_v28 = vld [vmem:[#allocation5 + $0x1e0] ss:$8 sps:$4 sm:$0xff]  }
  0xc4   : > { %1152 = vmatprep.subr.bf16.mxu0 %v2764_v29  ;;  %2498 = vmatprep.subr.bf16.mxu1 %v2764_v29  ;;  %v2844_v29 = vld [vmem:[%s3417_s16 + $0xc] ss:$16 sps:$4 sm:$0xff]  }
  0xc7   : > { %1153 = vmatpush1.bf16.msra.mxu0 %v2766_v30  ;;  %2514 = vmatpush1.bf16.msra.mxu1 %v2766_v30  ;;  %v2841_v30 = vld [vmem:[#allocation5 + $0x1f4] ss:$8 sps:$4 sm:$0xff]  }
  0xc8   : > { %1154 = vmatprep.subr.bf16.mxu0 %v2767_v31  ;;  %2499 = vmatprep.subr.bf16.mxu1 %v2767_v31  ;;  %v2910_v31 = vld [vmem:[%s3417_s16 + $0x1e0] ss:$16 sps:$4 sm:$0xff]  }
  0xcb   : > { %1155 = vmatpush1.bf16.msra.mxu0 %v2769_v32  ;;  %2515 = vmatpush1.bf16.msra.mxu1 %v2769_v32  ;;  %v2914_v32 = vld [vmem:[#allocation7] ss:$8 sps:$4 sm:$0xff]  }
  0xcc   : > { %1317 = vmatprep.subr.bf16.mxu0 %v2775_v33  ;;  %v2916_v33 = vld [vmem:[#allocation7 + $0x4] ss:$8 sps:$4 sm:$0xff]  }
  0xcd   : > { %1906 = vmatprep.subr.bf16.mxu1 %v2916_v33 }
  0xce   : > { %1157 = vmatmul.mubr.bf16.vlgmr.msra.gmra.mrb[0].mxu0 %v2770_v34  ;;  %1237 = vmatmul.mubr.bf16.vlgmr.msra.gmra.mrb[0].mxu1 %v2866_v38  ;;  %v2839_v34 = vld [vmem:[#allocation5 + $0x1f0] ss:$8 sps:$4 sm:$0xff]   ;;  %v2845_v38 = vld [vmem:[%s3417_s16 + $0x2c] ss:$16 sps:$4 sm:$0xff]  }
  0xcf   : > { %1318 = vmatpush1.bf16.msra.mxu0 %v2773_v35  ;;  %1166 = vmatprep.mubr.bf16.mxu0 %v2779_v37  ;;  %v2919_v35 = vld [vmem:[#allocation7 + $0x14] ss:$8 sps:$4 sm:$0xff]   ;;  %v2917_v37 = vld [vmem:[#allocation7 + $0x10] ss:$8 sps:$4 sm:$0xff]  }
  0xd0   : > { %1319 = vmatprep.subr.bf16.mxu0 %v2778_v36  ;;  %1246 = vmatprep.mubr.bf16.mxu1 %v2872_v41  ;;  %v2842_v36 = vld [vmem:[%s3417_s16 + $0x8] ss:$16 sps:$4 sm:$0xff]   ;;  %v2925_v41 = vld [vmem:[#allocation7 + $0x34] ss:$8 sps:$4 sm:$0xff]  }
  0xd1   : > { %1907 = vmatpush1.bf16.msra.mxu1 %v2914_v32 }
  0xd2   : > { %1908 = vmatprep.subr.bf16.mxu1 %v2919_v35 }
  0xd3   : > { %1320 = vmatpush1.bf16.msra.mxu0 %v2776_v40  ;;  %v2920_v40 = vld [vmem:[#allocation7 + $0x20] ss:$8 sps:$4 sm:$0xff]  }
  0xd4   : > { %1321 = vmatprep.subr.bf16.mxu0 %v2784_v43  ;;  %v2923_v43 = vld [vmem:[#allocation7 + $0x30] ss:$8 sps:$4 sm:$0xff]  }
  0xd5   : > { %1909 = vmatpush1.bf16.msra.mxu1 %v2917_v37 }
  0xd6   : > { %1167 = vmatmul.mubr.bf16.gmra.mrb[4].mxu0 %v2781_v42  ;;  %1247 = vmatmul.mubr.bf16.gmra.mrb[4].mxu1 %v2874_v47  ;;  %v2847_v42 = vld [vmem:[%s3417_s16 + $0x28] ss:$16 sps:$4 sm:$0xff]   ;;  %v2931_v47 = vld [vmem:[#allocation7 + $0x54] ss:$8 sps:$4 sm:$0xff]  }
  0xd7   : > { %1322 = vmatpush1.bf16.msra.mxu0 %v2782_v44  ;;  %1176 = vmatprep.mubr.bf16.mxu0 %v2788_v45  ;;  %v2848_v44 = vld [vmem:[%s3417_s16 + $0x4c] ss:$16 sps:$4 sm:$0xff]  }
  0xd8   : > { %1323 = vmatprep.subr.bf16.mxu0 %v2787_v46  ;;  %1256 = vmatprep.mubr.bf16.mxu1 %v2878_v49  ;;  %v2928_v45 = vld [vmem:[#allocation7 + $0x44] ss:$8 sps:$4 sm:$0xff]   ;;  %v2926_v46 = vld [vmem:[#allocation7 + $0x40] ss:$8 sps:$4 sm:$0xff]   ;;  %v2929_v49 = vld [vmem:[#allocation7 + $0x50] ss:$8 sps:$4 sm:$0xff]  }
  0xd9   : > { %1910 = vmatprep.subr.bf16.mxu1 %v2922_v39 }
  0xda   : > { %1911 = vmatpush1.bf16.msra.mxu1 %v2920_v40 }
  0xdb   : > { %1324 = vmatpush1.bf16.msra.mxu0 %v2785_v48  ;;  %1912 = vmatprep.subr.bf16.mxu1 %v2925_v41  ;;  %v2850_v48 = vld [vmem:[%s3417_s16 + $0x48] ss:$16 sps:$4 sm:$0xff]  }
  0xdc   : > { %1325 = vmatprep.subr.bf16.mxu0 %v2793_v50  ;;  %v2851_v50 = vld [vmem:[%s3417_s16 + $0x6c] ss:$16 sps:$4 sm:$0xff]  }
  0xde   : > { %1177 = vmatmul.mubr.bf16.gmra.mrb[8].mxu0 %v2790_v51  ;;  %1257 = vmatmul.mubr.bf16.gmra.mrb[8].mxu1 %v2880_v55  ;;  %v2934_v51 = vld [vmem:[#allocation7 + $0x64] ss:$8 sps:$4 sm:$0xff]   ;;  %v2935_v55 = vld [vmem:[#allocation7 + $0x70] ss:$8 sps:$4 sm:$0xff]  }
  0xdf   : > { %1326 = vmatpush1.bf16.msra.mxu0 %v2791_v52  ;;  %1186 = vmatprep.mubr.bf16.mxu0 %v2797_v53  ;;  %v2932_v52 = vld [vmem:[#allocation7 + $0x60] ss:$8 sps:$4 sm:$0xff]   ;;  %v2937_v53 = vld [vmem:[#allocation7 + $0x74] ss:$8 sps:$4 sm:$0xff]  }
  0xe0   : > { %1327 = vmatprep.subr.bf16.mxu0 %v2796_v54  ;;  %1266 = vmatprep.mubr.bf16.mxu1 %v2884_v57  ;;  %v2853_v54 = vld [vmem:[%s3417_s16 + $0x68] ss:$16 sps:$4 sm:$0xff]   ;;  %v2940_v57 = vld [vmem:[#allocation7 + $0x84] ss:$8 sps:$4 sm:$0xff]  }
  0xe1   : > { %1913 = vmatpush1.bf16.msra.mxu1 %v2923_v43 }
  0xe2   : > { %1914 = vmatprep.subr.bf16.mxu1 %v2928_v45 }
  0xe3   : > { %1328 = vmatpush1.bf16.msra.mxu0 %v2794_v56  ;;  %v2854_v56 = vld [vmem:[%s3417_s16 + $0x8c] ss:$16 sps:$4 sm:$0xff]  }
  0xe4   : > { %1329 = vmatprep.subr.bf16.mxu0 %v2802_v58  ;;  %v2938_v58 = vld [vmem:[#allocation7 + $0x80] ss:$8 sps:$4 sm:$0xff]  }
  0xe5   : > { %1915 = vmatpush1.bf16.msra.mxu1 %v2926_v46 }
  0xe6   : > { %1187 = vmatmul.mubr.bf16.gmra.mrb[12].mxu0 %v2799_v59  ;;  %1267 = vmatmul.mubr.bf16.gmra.mrb[12].mxu1 %v2886_v63  ;;  %v2943_v59 = vld [vmem:[#allocation7 + $0x94] ss:$8 sps:$4 sm:$0xff]   ;;  %v2946_v63 = vld [vmem:[#allocation7 + $0xa4] ss:$8 sps:$4 sm:$0xff]  }
  0xe7   : > { %1330 = vmatpush1.bf16.msra.mxu0 %v2800_v60  ;;  %1196 = vmatprep.mubr.bf16.mxu0 %v2806_v61  ;;  %v2856_v60 = vld [vmem:[%s3417_s16 + $0x88] ss:$16 sps:$4 sm:$0xff]  }
  0xe8   : > { %1331 = vmatprep.subr.bf16.mxu0 %v2805_v62  ;;  %1276 = vmatprep.mubr.bf16.mxu1 %v2890_v0  ;;  %v2941_v61 = vld [vmem:[#allocation7 + $0x90] ss:$8 sps:$4 sm:$0xff]   ;;  %v2857_v62 = vld [vmem:[%s3417_s16 + $0xac] ss:$16 sps:$4 sm:$0xff]   ;;  %v2944_v0 = vld [vmem:[#allocation7 + $0xa0] ss:$8 sps:$4 sm:$0xff]  }
  0xe9   : > { %1916 = vmatprep.subr.bf16.mxu1 %v2931_v47 }
  0xea   : > { %1917 = vmatpush1.bf16.msra.mxu1 %v2929_v49 }
  0xeb   : > { %1332 = vmatpush1.bf16.msra.mxu0 %v2803_v1  ;;  %1918 = vmatprep.subr.bf16.mxu1 %v2934_v51  ;;  %v2949_v1 = vld [vmem:[#allocation7 + $0xb4] ss:$8 sps:$4 sm:$0xff]  }
  0xec   : > { %1333 = vmatprep.subr.bf16.mxu0 %v2811_v2  ;;  %v2859_v2 = vld [vmem:[%s3417_s16 + $0xa8] ss:$16 sps:$4 sm:$0xff]  }
  0xee   : > { %1197 = vmatmul.mubr.bf16.gmra.mrb[16].mxu0 %v2808_v3  ;;  %1277 = vmatmul.mubr.bf16.gmra.mrb[16].mxu1 %v2892_v7  ;;  %v2947_v3 = vld [vmem:[#allocation7 + $0xb0] ss:$8 sps:$4 sm:$0xff]   ;;  %v2955_v7 = vld [vmem:[#allocation7 + $0xd4] ss:$8 sps:$4 sm:$0xff]  }
  0xef   : > { %1334 = vmatpush1.bf16.msra.mxu0 %v2809_v4  ;;  %1206 = vmatprep.mubr.bf16.mxu0 %v2815_v5  ;;  %v2860_v4 = vld [vmem:[%s3417_s16 + $0xcc] ss:$16 sps:$4 sm:$0xff]  }
  0xf0   : > { %1335 = vmatprep.subr.bf16.mxu0 %v2814_v6  ;;  %1286 = vmatprep.mubr.bf16.mxu1 %v2896_v8  ;;  %v2952_v5 = vld [vmem:[#allocation7 + $0xc4] ss:$8 sps:$4 sm:$0xff]   ;;  %v2950_v6 = vld [vmem:[#allocation7 + $0xc0] ss:$8 sps:$4 sm:$0xff]  }
  0xf1   : > { %1919 = vmatpush1.bf16.msra.mxu1 %v2932_v52  ;;  %v2862_v8 = vld [vmem:[%s3417_s16 + $0xc8] ss:$16 sps:$4 sm:$0xff]  }
  0xf2   : > { %1920 = vmatprep.subr.bf16.mxu1 %v2937_v53 }
  0xf3   : > { %1336 = vmatpush1.bf16.msra.mxu0 %v2812_v9  ;;  %v2953_v9 = vld [vmem:[#allocation7 + $0xd0] ss:$8 sps:$4 sm:$0xff]  }
  0xf4   : > { %1337 = vmatprep.subr.bf16.mxu0 %v2820_v10  ;;  %v2863_v10 = vld [vmem:[%s3417_s16 + $0xec] ss:$16 sps:$4 sm:$0xff]  }
  0xf5   : > { %1921 = vmatpush1.bf16.msra.mxu1 %v2935_v55 }
  0xf6   : > { %1207 = vmatmul.mubr.bf16.gmra.mrb[20].mxu0 %v2817_v11  ;;  %1287 = vmatmul.mubr.bf16.gmra.mrb[20].mxu1 %v2898_v15  ;;  %v2865_v11 = vld [vmem:[%s3417_s16 + $0xe8] ss:$16 sps:$4 sm:$0xff]  }
  0xf7   : > { %1338 = vmatpush1.bf16.msra.mxu0 %v2818_v12  ;;  %1216 = vmatprep.mubr.bf16.mxu0 %v2824_v13  ;;  %v2869_v12 = vld [vmem:[%s3417_s16 + $0x10c] ss:$16 sps:$4 sm:$0xff]   ;;  %v2871_v13 = vld [vmem:[%s3417_s16 + $0x108] ss:$16 sps:$4 sm:$0xff]  }
  0xf8   : > { %1339 = vmatprep.subr.bf16.mxu0 %v2823_v14  ;;  %1296 = vmatprep.mubr.bf16.mxu1 %v2902_v16  ;;  %v2875_v14 = vld [vmem:[%s3417_s16 + $0x12c] ss:$16 sps:$4 sm:$0xff]   ;;  %v2877_v15 = vld [vmem:[%s3417_s16 + $0x128] ss:$16 sps:$4 sm:$0xff]  }
  0xf9   : > { %1922 = vmatprep.subr.bf16.mxu1 %v2940_v57  ;;  %v2881_v16 = vld [vmem:[%s3417_s16 + $0x14c] ss:$16 sps:$4 sm:$0xff]  }
  0xfa   : > { %1923 = vmatpush1.bf16.msra.mxu1 %v2938_v58 }
  0xfb   : > { %1340 = vmatpush1.bf16.msra.mxu0 %v2821_v17  ;;  %1924 = vmatprep.subr.bf16.mxu1 %v2943_v59  ;;  %v2883_v17 = vld [vmem:[%s3417_s16 + $0x148] ss:$16 sps:$4 sm:$0xff]  }
  0xfc   : > { %1341 = vmatprep.subr.bf16.mxu0 %v2829_v18  ;;  %v2887_v18 = vld [vmem:[%s3417_s16 + $0x16c] ss:$16 sps:$4 sm:$0xff]  }
  0xfe   : > { %1217 = vmatmul.mubr.bf16.gmra.mrb[24].mxu0 %v2826_v19  ;;  %1297 = vmatmul.mubr.bf16.gmra.mrb[24].mxu1 %v2904_v23  ;;  %v2889_v19 = vld [vmem:[%s3417_s16 + $0x168] ss:$16 sps:$4 sm:$0xff]   ;;  %v2961_v23 = vld [vmem:[#allocation7 + $0xf4] ss:$8 sps:$4 sm:$0xff]  }
  0xff   : > { %1342 = vmatpush1.bf16.msra.mxu0 %v2827_v20  ;;  %1226 = vmatprep.mubr.bf16.mxu0 %v2833_v21  ;;  %v2958_v20 = vld [vmem:[#allocation7 + $0xe4] ss:$8 sps:$4 sm:$0xff]  }
 0x100   : > { %1343 = vmatprep.subr.bf16.mxu0 %v2832_v22  ;;  %1306 = vmatprep.mubr.bf16.mxu1 %v2908_v24  ;;  %v2893_v21 = vld [vmem:[%s3417_s16 + $0x18c] ss:$16 sps:$4 sm:$0xff]   ;;  %v2956_v22 = vld [vmem:[#allocation7 + $0xe0] ss:$8 sps:$4 sm:$0xff]   ;;  %v2959_v24 = vld [vmem:[#allocation7 + $0xf0] ss:$8 sps:$4 sm:$0xff]  }
 0x101   : > { %1925 = vmatpush1.bf16.msra.mxu1 %v2941_v61 }
 0x102   : > { %1926 = vmatprep.subr.bf16.mxu1 %v2946_v63  ;;  %v472_v63 = vld [vmem:[%s3902_s2] sm:$0x3] }
 0x103   : > { %1344 = vmatpush1.bf16.msra.mxu0 %v2830_v25  ;;  %v2895_v25 = vld [vmem:[%s3417_s16 + $0x188] ss:$16 sps:$4 sm:$0xff]  }
 0x104   : > { %1345 = vmatprep.subr.bf16.mxu0 %v2838_v26  ;;  %v2899_v26 = vld [vmem:[%s3417_s16 + $0x1ac] ss:$16 sps:$4 sm:$0xff]  }
 0x105   : > { %1927 = vmatpush1.bf16.msra.mxu1 %v2944_v0 }
 0x106   : > { %1227 = vmatmul.mubr.bf16.gmra.mrb[28].mxu0 %v2835_v27  ;;  %1307 = vmatmul.mubr.bf16.gmra.mrb[28].mxu1 %v2910_v31  ;;  %v2901_v27 = vld [vmem:[%s3417_s16 + $0x1a8] ss:$16 sps:$4 sm:$0xff]  }
 0x107   : > { %1346 = vmatpush1.bf16.msra.mxu0 %v2836_v28  ;;  %1349 = vmatprep.mubr.bf16.mxu0 %v2844_v29  ;;  %v2905_v28 = vld [vmem:[%s3417_s16 + $0x1cc] ss:$16 sps:$4 sm:$0xff]   ;;  %v2907_v29 = vld [vmem:[%s3417_s16 + $0x1c8] ss:$16 sps:$4 sm:$0xff]  }
 0x108   : > { %1347 = vmatprep.subr.bf16.mxu0 %v2841_v30  ;;  %1928 = vmatprep.subr.bf16.mxu1 %v2949_v1  ;;  %v2911_v30 = vld [vmem:[%s3417_s16 + $0x1ec] ss:$16 sps:$4 sm:$0xff]   ;;  %v2913_v31 = vld [vmem:[%s3417_s16 + $0x1e8] ss:$16 sps:$4 sm:$0xff]   ;;  %s3084_s16 = scalar_lea.vmem %s3083_s12, 16384 }
 0x109   : > { %1929 = vmatpush1.bf16.msra.mxu1 %v2947_v3  ;;  %p3086_p0 = scmp.lt.s32.totalorder %s3084_s16, %s3078_s14 }
 0x10a   : > { %1930 = vmatprep.subr.bf16.mxu1 %v2952_v5  ;;  %v1510_v5 = vld [vmem:[%s3429_s20] sm:$0xff] }
 0x10b   : > { %1348 = vmatpush1.bf16.msra.mxu0 %v2839_v34  ;;  %p3087_p12 = por %p3086_p0, %p3085_p13 }
 0x10d   : > { %1931 = vmatpush1.bf16.msra.mxu1 %v2950_v6  ;;  %p3088_p3 = pnand %p3087_p12, %p3081_p11 }
 0x10e   : > { %1350 = vmatmul.mubr.bf16.vlgmr.msra.gmra.mrb[0].mxu0 %v2842_v36  ;;  %1932 = vmatprep.subr.bf16.mxu1 %v2955_v7  ;;  %v1511_v7 = vld [vmem:[%s3429_s20 + $0x8] sm:$0xff] }
 0x10f   : > { %1359 = vmatprep.mubr.bf16.mxu0 %v2845_v38 }
 0x111   : > { %1933 = vmatpush1.bf16.msra.mxu1 %v2953_v9 }
 0x112   : > { %1934 = vmatprep.subr.bf16.mxu1 %v2958_v20 }
 0x115   : > { %1935 = vmatpush1.bf16.msra.mxu1 %v2956_v22 }
 0x116   : > { %1360 = vmatmul.mubr.bf16.gmra.mrb[4].mxu0 %v2847_v42  ;;  %1936 = vmatprep.subr.bf16.mxu1 %v2961_v23 }
 0x117   : > { %1369 = vmatprep.mubr.bf16.mxu0 %v2848_v44 }
 0x119   : > { %1937 = vmatpush1.bf16.msra.mxu1 %v2959_v24 }
 0x11e   : > { %1370 = vmatmul.mubr.bf16.gmra.mrb[8].mxu0 %v2850_v48 }
 0x11f   : > { %1379 = vmatprep.mubr.bf16.mxu0 %v2851_v50 }
 0x126   : > { %1380 = vmatmul.mubr.bf16.gmra.mrb[12].mxu0 %v2853_v54 }
 0x127   : > { %1389 = vmatprep.mubr.bf16.mxu0 %v2854_v56  ;;  %v474_v56 = vlaneseq }
 0x129   : > { %v3551_v59 = vshrl.u32 %v474_v56, 7 }
 0x12b   : > { %v480_v0 = vsub.s32 1, %v3551_v59 }
 0x12d   : > { %v3575_v6 = vrot.slane %v472_v63, %v480_v0 }
 0x12e   : > { %1390 = vmatmul.mubr.bf16.gmra.mrb[16].mxu0 %v2856_v60 }
 0x12f   : > { %1399 = vmatprep.mubr.bf16.mxu0 %v2857_v62  ;;  %v476_v62 = vsub.s32 0, %v3551_v59 }
 0x131   : > { %v3568_v3 = vrot.slane %v472_v63, %v476_v62 }
 0x136   : > { %1400 = vmatmul.mubr.bf16.gmra.mrb[20].mxu0 %v2859_v2 }
 0x137   : > { %1409 = vmatprep.mubr.bf16.mxu0 %v2860_v4 }
 0x13e   : > { %1410 = vmatmul.mubr.bf16.gmra.mrb[24].mxu0 %v2862_v8 }
 0x13f   : > { %1419 = vmatprep.mubr.bf16.mxu0 %v2863_v10 }
 0x146   : > { %1420 = vmatmul.mubr.bf16.gmra.mrb[28].mxu0 %v2865_v11  ;;  %v1542_v11 = vunpack.c.l.bf16 %v1510_v5 }
 0x147   : > { %1429 = vmatprep.mubr.bf16.mxu0 %v2869_v12 }
 0x14e   : > { %1430 = vmatmul.mubr.bf16.gmra.mrb[32].mxu0 %v2871_v13  ;;  %v1544_v13 = vunpack.c.l.bf16 %v1511_v7 }
 0x14f   : > { %1439 = vmatprep.mubr.bf16.mxu0 %v2875_v14 }
 0x156   : > { %1440 = vmatmul.mubr.bf16.gmra.mrb[36].mxu0 %v2877_v15  ;;  %v1543_v15 = vunpack.c.h.bf16 %v1510_v5 }
 0x157   : > { %1449 = vmatprep.mubr.bf16.mxu0 %v2881_v16 }
 0x15e   : > { %1450 = vmatmul.mubr.bf16.gmra.mrb[40].mxu0 %v2883_v17  ;;  %v1545_v17 = vunpack.c.h.bf16 %v1511_v7 }
 0x15f   : > { %1459 = vmatprep.mubr.bf16.mxu0 %v2887_v18 }
 0x166   : > { %1460 = vmatmul.mubr.bf16.gmra.mrb[44].mxu0 %v2889_v19 }
 0x167   : > { %1469 = vmatprep.mubr.bf16.mxu0 %v2893_v21 }
 0x16e   : > { %1470 = vmatmul.mubr.bf16.gmra.mrb[48].mxu0 %v2895_v25  ;;  %v1512_v25 = vld [vmem:[%s3429_s20 + $0x10] sm:$0xff] }
 0x16f   : > { %1479 = vmatprep.mubr.bf16.mxu0 %v2899_v26  ;;  %v1513_v26 = vld [vmem:[%s3429_s20 + $0x18] sm:$0xff]  ;;  %v1547_v7 = vunpack.c.h.bf16 %v1512_v25 }
 0x170   : > { %v1548_v63 = vunpack.c.l.bf16 %v1513_v26 }
 0x176   : > { %1480 = vmatmul.mubr.bf16.gmra.mrb[52].mxu0 %v2901_v27 }
 0x177   : > { %1489 = vmatprep.mubr.bf16.mxu0 %v2905_v28 }
 0x17e   : > { %1490 = vmatmul.mubr.bf16.gmra.mrb[56].mxu0 %v2907_v29 }
 0x17f   : > { %1499 = vmatprep.mubr.bf16.mxu0 %v2911_v30 }
 0x186   : > { %1500 = vmatmul.mubr.bf16.gmra.mrb[60].mxu0 %v2913_v31  ;;  %v1546_v31 = vunpack.c.l.bf16 %v1512_v25 }
 0x1a1   : > { %v3499_v32 = vpop.f32.mrb[0].mxu1 }
 0x1a2   : > { %v3501_v33 = vpop.f32.mrb[1].mxu1 }
 0x1a3   : > { %v3503_v34 = vpop.f32.mrb[2].mxu1 }
 0x1a4   : > { %v3505_v35 = vpop.f32.mrb[3].mxu1 }
 0x1a9   : > { %v3507_v36 = vpop.f32.mrb[4].mxu1 }
 0x1aa   : > { %v3509_v37 = vpop.f32.mrb[5].mxu1 }
 0x1ab   : > { %v3511_v38 = vpop.f32.mrb[6].mxu1 }
 0x1ac   : > { %v3513_v39 = vpop.f32.mrb[7].mxu1 }
 0x1b1   : > { %v3515_v40 = vpop.f32.mrb[8].mxu1 }
 0x1b2   : > { %v3517_v41 = vpop.f32.mrb[9].mxu1 }
 0x1b3   : > { %v3519_v42 = vpop.f32.mrb[10].mxu1 }
 0x1b4   : > { %v3521_v43 = vpop.f32.mrb[11].mxu1 }
 0x1b9   : > { %v3523_v44 = vpop.f32.mrb[12].mxu1 }
 0x1ba   : > { %v3525_v45 = vpop.f32.mrb[13].mxu1 }
 0x1bb   : > { %v3527_v46 = vpop.f32.mrb[14].mxu1 }
 0x1bc   : > { %v3529_v47 = vpop.f32.mrb[15].mxu1 }
 0x1c1   : > { %v3531_v48 = vpop.f32.mrb[16].mxu1 }
 0x1c2   : > { %v3533_v49 = vpop.f32.mrb[17].mxu1 }
 0x1c3   : > { %v3535_v50 = vpop.f32.mrb[18].mxu1 }
 0x1c4   : > { %v3537_v51 = vpop.f32.mrb[19].mxu1 }
 0x1c9   : > { %v3539_v52 = vpop.f32.mrb[20].mxu1 }
 0x1ca   : > { %v3541_v53 = vpop.f32.mrb[21].mxu1 }
 0x1cb   : > { %v3543_v54 = vpop.f32.mrb[22].mxu1 }
 0x1cc   : > { %v3545_v55 = vpop.f32.mrb[23].mxu1 }
 0x1d1   : > { %v3547_v57 = vpop.f32.mrb[24].mxu1 }
 0x1d2   : > { %v3549_v58 = vpop.f32.mrb[25].mxu1 }
 0x1d3   : > { %v3553_v60 = vpop.f32.mrb[26].mxu1 }
 0x1d4   : > { %v3555_v61 = vpop.f32.mrb[27].mxu1 }
 0x1d9   : > { %v3562_v1 = vpop.f32.mrb[28].mxu1 }
 0x1da   : > { %v3564_v2 = vpop.f32.mrb[29].mxu1 }
 0x1db   : > { %v3570_v4 = vpop.f32.mrb[30].mxu1 }
 0x1dc   : > { %v3578_v8 = vpop.f32.mrb[31].mxu1 }
 0x1e1   : > { %v1351_v9 = vpop.f32.mrb[0].mxu0 }
 0x1e2   : > { %v2516_v10 = vadd.f32 %v1351_v9, %v3568_v3  ;;  %v1353_v12 = vpop.f32.mrb[1].mxu0 }
 0x1e3   : > { %v2517_v14 = vadd.f32 %v1353_v12, %v3575_v6  ;;  %v1355_v16 = vpop.f32.mrb[2].mxu0 }
 0x1e4   : > { %v2518_v18 = vadd.f32 %v1355_v16, %v3568_v3  ;;  %v1357_v19 = vpop.f32.mrb[3].mxu0  ;;  %v1606_v21 = vmul.f32 %v2516_v10, %v1542_v11  ;;  %v1549_v10 = vunpack.c.h.bf16 %v1513_v26 }
 0x1e5   : > { %v2519_v20 = vadd.f32 %v1357_v19, %v3575_v6  ;;  %v1607_v23 = vmul.f32 %v2517_v14, %v1543_v15  ;;  %v1515_v19 = vld [vmem:[%s3429_s20 + $0x28] sm:$0xff] }
 0x1e6   : > { %v1608_v22 = vmul.f32 %v2518_v18, %v1544_v13  ;;  %v1514_v18 = vld [vmem:[%s3429_s20 + $0x20] sm:$0xff]  ;;  %v1552_v26 = vunpack.c.l.bf16 %v1515_v19 }
 0x1e7   : > { %v1609_v24 = vmul.f32 %v2519_v20, %v1545_v17 }
 0x1e8   : > { %v1670_v27 = vpack.c.bf16 %v1608_v22, %v1606_v21 }
 0x1e9   : > { %v1361_v28 = vpop.f32.mrb[4].mxu0  ;;  %v1671_v29 = vpack.c.bf16 %v1609_v24, %v1607_v23  ;;  %v1550_v24 = vunpack.c.l.bf16 %v1514_v18 }
 0x1ea   : > { %v2520_v30 = vadd.f32 %v1361_v28, %v3568_v3  ;;  %v1363_v56 = vpop.f32.mrb[5].mxu0  ;;  %v1551_v28 = vunpack.c.h.bf16 %v1514_v18 }
 0x1eb   : > { %v2521_v5 = vadd.f32 %v1363_v56, %v3575_v6  ;;  %v1365_v9 = vpop.f32.mrb[6].mxu0  ;;  %1938 = vmatprep.mubr.bf16.mxu1 %v1671_v29 }
 0x1ec   : > { %v2522_v11 = vadd.f32 %v1365_v9, %v3568_v3  ;;  %v1367_v12 = vpop.f32.mrb[7].mxu0  ;;  %1939 = vmatmul.mubr.bf16.vlgmr.msra.gmra.mrb[32].mxu1 %v1670_v27  ;;  %v1610_v14 = vmul.f32 %v2520_v30, %v1546_v31  ;;  %v1553_v30 = vunpack.c.h.bf16 %v1515_v19 }
 0x1ed   : > { %v2523_v13 = vadd.f32 %v1367_v12, %v3575_v6  ;;  %v1611_v16 = vmul.f32 %v2521_v5, %v1547_v7  ;;  %v1517_v12 = vld [vmem:[%s3429_s20 + $0x38] sm:$0xff] }
 0x1ee   : > { %v1612_v15 = vmul.f32 %v2522_v11, %v1548_v63  ;;  %v1516_v11 = vld [vmem:[%s3429_s20 + $0x30] sm:$0xff]  ;;  %v1556_v19 = vunpack.c.l.bf16 %v1517_v12 }
 0x1ef   : > { %v1613_v17 = vmul.f32 %v2523_v13, %v1549_v10 }
 0x1f0   : > { %v1672_v20 = vpack.c.bf16 %v1612_v15, %v1610_v14 }
 0x1f1   : > { %v1371_v21 = vpop.f32.mrb[8].mxu0  ;;  %v1673_v22 = vpack.c.bf16 %v1613_v17, %v1611_v16  ;;  %v1554_v17 = vunpack.c.l.bf16 %v1516_v11 }
 0x1f2   : > { %v2524_v23 = vadd.f32 %v1371_v21, %v3568_v3  ;;  %v1373_v25 = vpop.f32.mrb[9].mxu0  ;;  %v1555_v21 = vunpack.c.h.bf16 %v1516_v11 }
 0x1f3   : > { %v2525_v27 = vadd.f32 %v1373_v25, %v3575_v6  ;;  %v1375_v29 = vpop.f32.mrb[10].mxu0  ;;  %1948 = vmatprep.mubr.bf16.mxu1 %v1673_v22 }
 0x1f4   : > { %v2526_v31 = vadd.f32 %v1375_v29, %v3568_v3  ;;  %v1377_v56 = vpop.f32.mrb[11].mxu0  ;;  %1949 = vmatmul.mubr.bf16.gmra.mrb[36].mxu1 %v1672_v20  ;;  %v1614_v5 = vmul.f32 %v2524_v23, %v1550_v24  ;;  %v1557_v23 = vunpack.c.h.bf16 %v1517_v12 }
 0x1f5   : > { %v2527_v63 = vadd.f32 %v1377_v56, %v3575_v6  ;;  %v1615_v9 = vmul.f32 %v2525_v27, %v1551_v28  ;;  %v1519_v56 = vld [vmem:[%s3429_s20 + $0x48] sm:$0xff] }
 0x1f6   : > { %v1616_v7 = vmul.f32 %v2526_v31, %v1552_v26  ;;  %v1518_v31 = vld [vmem:[%s3429_s20 + $0x40] sm:$0xff]  ;;  %v1560_v12 = vunpack.c.l.bf16 %v1519_v56 }
 0x1f7   : > { %v1617_v10 = vmul.f32 %v2527_v63, %v1553_v30 }
 0x1f8   : > { %v1674_v13 = vpack.c.bf16 %v1616_v7, %v1614_v5 }
 0x1f9   : > { %v1381_v14 = vpop.f32.mrb[12].mxu0  ;;  %v1675_v15 = vpack.c.bf16 %v1617_v10, %v1615_v9  ;;  %v1558_v10 = vunpack.c.l.bf16 %v1518_v31 }
 0x1fa   : > { %v2528_v16 = vadd.f32 %v1381_v14, %v3568_v3  ;;  %v1383_v18 = vpop.f32.mrb[13].mxu0  ;;  %v1559_v14 = vunpack.c.h.bf16 %v1518_v31 }
 0x1fb   : > { %v2529_v20 = vadd.f32 %v1383_v18, %v3575_v6  ;;  %v1385_v22 = vpop.f32.mrb[14].mxu0  ;;  %1958 = vmatprep.mubr.bf16.mxu1 %v1675_v15 }
 0x1fc   : > { %v2530_v24 = vadd.f32 %v1385_v22, %v3568_v3  ;;  %v1387_v25 = vpop.f32.mrb[15].mxu0  ;;  %1959 = vmatmul.mubr.bf16.gmra.mrb[40].mxu1 %v1674_v13  ;;  %v1618_v27 = vmul.f32 %v2528_v16, %v1554_v17  ;;  %v1561_v16 = vunpack.c.h.bf16 %v1519_v56 }
 0x1fd   : > { %v2531_v26 = vadd.f32 %v1387_v25, %v3575_v6  ;;  %v1619_v29 = vmul.f32 %v2529_v20, %v1555_v21  ;;  %v1521_v25 = vld [vmem:[%s3429_s20 + $0x58] sm:$0xff] }
 0x1fe   : > { %v1620_v28 = vmul.f32 %v2530_v24, %v1556_v19  ;;  %v1520_v24 = vld [vmem:[%s3429_s20 + $0x50] sm:$0xff]  ;;  %v1564_v56 = vunpack.c.l.bf16 %v1521_v25 }
 0x1ff   : > { %v1621_v30 = vmul.f32 %v2531_v26, %v1557_v23 }
 0x200   : > { %v1676_v63 = vpack.c.bf16 %v1620_v28, %v1618_v27 }
 0x201   : > { %v1391_v5 = vpop.f32.mrb[16].mxu0  ;;  %v1677_v7 = vpack.c.bf16 %v1621_v30, %v1619_v29  ;;  %v1562_v30 = vunpack.c.l.bf16 %v1520_v24 }
 0x202   : > { %v2532_v9 = vadd.f32 %v1391_v5, %v3568_v3  ;;  %v1393_v11 = vpop.f32.mrb[17].mxu0  ;;  %v1563_v5 = vunpack.c.h.bf16 %v1520_v24 }
 0x203   : > { %v2533_v13 = vadd.f32 %v1393_v11, %v3575_v6  ;;  %v1395_v15 = vpop.f32.mrb[18].mxu0  ;;  %1968 = vmatprep.mubr.bf16.mxu1 %v1677_v7 }
 0x204   : > { %v2534_v17 = vadd.f32 %v1395_v15, %v3568_v3  ;;  %v1397_v18 = vpop.f32.mrb[19].mxu0  ;;  %1969 = vmatmul.mubr.bf16.gmra.mrb[44].mxu1 %v1676_v63  ;;  %v1622_v20 = vmul.f32 %v2532_v9, %v1558_v10  ;;  %v1565_v9 = vunpack.c.h.bf16 %v1521_v25 }
 0x205   : > { %v2535_v19 = vadd.f32 %v1397_v18, %v3575_v6  ;;  %v1623_v22 = vmul.f32 %v2533_v13, %v1559_v14  ;;  %v1523_v18 = vld [vmem:[%s3429_s20 + $0x68] sm:$0xff] }
 0x206   : > { %v1624_v21 = vmul.f32 %v2534_v17, %v1560_v12  ;;  %v1522_v17 = vld [vmem:[%s3429_s20 + $0x60] sm:$0xff]  ;;  %v1568_v25 = vunpack.c.l.bf16 %v1523_v18 }
 0x207   : > { %v1625_v23 = vmul.f32 %v2535_v19, %v1561_v16 }
 0x208   : > { %v1678_v26 = vpack.c.bf16 %v1624_v21, %v1622_v20 }
 0x209   : > { %v1401_v27 = vpop.f32.mrb[20].mxu0  ;;  %v1679_v28 = vpack.c.bf16 %v1625_v23, %v1623_v22  ;;  %v1566_v23 = vunpack.c.l.bf16 %v1522_v17 }
 0x20a   : > { %v2536_v29 = vadd.f32 %v1401_v27, %v3568_v3  ;;  %v1403_v31 = vpop.f32.mrb[21].mxu0  ;;  %v1567_v27 = vunpack.c.h.bf16 %v1522_v17 }
 0x20b   : > { %v2537_v63 = vadd.f32 %v1403_v31, %v3575_v6  ;;  %v1405_v7 = vpop.f32.mrb[22].mxu0  ;;  %1978 = vmatprep.mubr.bf16.mxu1 %v1679_v28 }
 0x20c   : > { %v2538_v10 = vadd.f32 %v1405_v7, %v3568_v3  ;;  %v1407_v11 = vpop.f32.mrb[23].mxu0  ;;  %1979 = vmatmul.mubr.bf16.gmra.mrb[48].mxu1 %v1678_v26  ;;  %v1626_v13 = vmul.f32 %v2536_v29, %v1562_v30  ;;  %v1569_v29 = vunpack.c.h.bf16 %v1523_v18 }
 0x20d   : > { %v2539_v12 = vadd.f32 %v1407_v11, %v3575_v6  ;;  %v1627_v15 = vmul.f32 %v2537_v63, %v1563_v5  ;;  %v1525_v11 = vld [vmem:[%s3429_s20 + $0x78] sm:$0xff] }
 0x20e   : > { %v1628_v14 = vmul.f32 %v2538_v10, %v1564_v56  ;;  %v1524_v10 = vld [vmem:[%s3429_s20 + $0x70] sm:$0xff]  ;;  %v1572_v18 = vunpack.c.l.bf16 %v1525_v11 }
 0x20f   : > { %v1629_v16 = vmul.f32 %v2539_v12, %v1565_v9 }
 0x210   : > { %v1680_v19 = vpack.c.bf16 %v1628_v14, %v1626_v13 }
 0x211   : > { %v1411_v20 = vpop.f32.mrb[24].mxu0  ;;  %v1681_v21 = vpack.c.bf16 %v1629_v16, %v1627_v15  ;;  %v1570_v16 = vunpack.c.l.bf16 %v1524_v10 }
 0x212   : > { %v2540_v22 = vadd.f32 %v1411_v20, %v3568_v3  ;;  %v1413_v24 = vpop.f32.mrb[25].mxu0 }
 0x213   : > { %v2541_v26 = vadd.f32 %v1413_v24, %v3575_v6  ;;  %v1415_v28 = vpop.f32.mrb[26].mxu0  ;;  %1988 = vmatprep.mubr.bf16.mxu1 %v1681_v21 }
 0x214   : > { %v2542_v30 = vadd.f32 %v1415_v28, %v3568_v3  ;;  %v1417_v31 = vpop.f32.mrb[27].mxu0  ;;  %1989 = vmatmul.mubr.bf16.gmra.mrb[52].mxu1 %v1680_v19  ;;  %v1630_v63 = vmul.f32 %v2540_v22, %v1566_v23  ;;  %v1571_v19 = vunpack.c.h.bf16 %v1524_v10  ;;  %v1573_v22 = vunpack.c.h.bf16 %v1525_v11 }
 0x215   : > { %v2543_v56 = vadd.f32 %v1417_v31, %v3575_v6  ;;  %v1631_v7 = vmul.f32 %v2541_v26, %v1567_v27  ;;  %v1239_v28 = vadd.f32 %v3499_v32, %v3568_v3  ;;  %v1241_v31 = vadd.f32 %v3501_v33, %v3575_v6 }
 0x216   : > { %v1632_v5 = vmul.f32 %v2542_v30, %v1568_v25  ;;  %v1243_v10 = vadd.f32 %v3503_v34, %v3568_v3  ;;  %v1245_v32 = vadd.f32 %v3505_v35, %v3575_v6  ;;  %v1251_v35 = vadd.f32 %v3509_v37, %v3575_v6 }
 0x217   : > { %v1633_v9 = vmul.f32 %v2543_v56, %v1569_v29  ;;  %v1526_v56 = vld [vmem:[%s3429_s20 + $0x80] sm:$0xff] }
 0x218   : > { %v1682_v12 = vpack.c.bf16 %v1632_v5, %v1630_v63  ;;  %v1527_v63 = vld [vmem:[%s3429_s20 + $0x88] sm:$0xff] }
 0x219   : > { %v1421_v13 = vpop.f32.mrb[28].mxu0  ;;  %v1683_v14 = vpack.c.bf16 %v1633_v9, %v1631_v7 }
 0x21a   : > { %v2544_v15 = vadd.f32 %v1421_v13, %v3568_v3  ;;  %v1423_v17 = vpop.f32.mrb[29].mxu0 }
 0x21b   : > { %v2545_v20 = vadd.f32 %v1423_v17, %v3575_v6  ;;  %v1425_v21 = vpop.f32.mrb[30].mxu0  ;;  %1998 = vmatprep.mubr.bf16.mxu1 %v1683_v14  ;;  %v1576_v14 = vunpack.c.l.bf16 %v1527_v63  ;;  %v1577_v17 = vunpack.c.h.bf16 %v1527_v63 }
 0x21c   : > { %v2546_v23 = vadd.f32 %v1425_v21, %v3568_v3  ;;  %v1427_v24 = vpop.f32.mrb[31].mxu0  ;;  %1999 = vmatmul.mubr.bf16.gmra.mrb[56].mxu1 %v1682_v12  ;;  %v1634_v26 = vmul.f32 %v2544_v15, %v1570_v16  ;;  %v1574_v12 = vunpack.c.l.bf16 %v1526_v56  ;;  %v1575_v16 = vunpack.c.h.bf16 %v1526_v56 }
 0x21d   : > { %v2547_v25 = vadd.f32 %v1427_v24, %v3575_v6  ;;  %v1635_v29 = vmul.f32 %v2545_v20, %v1571_v19 }
 0x21e   : > { %v1636_v27 = vmul.f32 %v2546_v23, %v1572_v18 }
 0x21f   : > { %v1637_v30 = vmul.f32 %v2547_v25, %v1573_v22  ;;  %v1249_v22 = vadd.f32 %v3507_v36, %v3568_v3  ;;  %v1528_v25 = vld [vmem:[%s3429_s20 + $0x90] sm:$0xff]  ;;  %v1255_v36 = vadd.f32 %v3513_v39, %v3575_v6  ;;  %v1261_v39 = vadd.f32 %v3517_v41, %v3575_v6 }
 0x220   : > { %v1684_v5 = vpack.c.bf16 %v1636_v27, %v1634_v26  ;;  %v1529_v26 = vld [vmem:[%s3429_s20 + $0x98] sm:$0xff]  ;;  %v1578_v56 = vunpack.c.l.bf16 %v1528_v25 }
 0x221   : > { %v1431_v7 = vpop.f32.mrb[32].mxu0  ;;  %v1685_v9 = vpack.c.bf16 %v1637_v30, %v1635_v29  ;;  %v1253_v30 = vadd.f32 %v3511_v38, %v3568_v3 }
 0x222   : > { %v1432_v11 = vadd.f32 %v1431_v7, %v1239_v28  ;;  %v1433_v13 = vpop.f32.mrb[33].mxu0 }
 0x223   : > { %v1434_v15 = vadd.f32 %v1433_v13, %v1241_v31  ;;  %v1435_v33 = vpop.f32.mrb[34].mxu0  ;;  %2008 = vmatprep.mubr.bf16.mxu1 %v1685_v9  ;;  %v1579_v9 = vunpack.c.h.bf16 %v1528_v25 }
 0x224   : > { %v1436_v18 = vadd.f32 %v1435_v33, %v1243_v10  ;;  %v1437_v20 = vpop.f32.mrb[35].mxu0  ;;  %2009 = vmatmul.mubr.bf16.gmra.mrb[60].mxu1 %v1684_v5  ;;  %v1638_v21 = vmul.f32 %v1574_v12, %v1432_v11  ;;  %v1580_v5 = vunpack.c.l.bf16 %v1529_v26  ;;  %v1581_v10 = vunpack.c.h.bf16 %v1529_v26  ;;  %v1530_v33 = vld [vmem:[%s3429_s20 + $0xa0] sm:$0xff] }
 0x225   : > { %v1438_v19 = vadd.f32 %v1437_v20, %v1245_v32  ;;  %v1639_v23 = vmul.f32 %v1575_v16, %v1434_v15  ;;  %v1259_v32 = vadd.f32 %v3515_v40, %v3568_v3  ;;  %v1265_v40 = vadd.f32 %v3521_v43, %v3575_v6 }
 0x226   : > { %v1640_v34 = vmul.f32 %v1576_v14, %v1436_v18  ;;  %v1583_v25 = vunpack.c.h.bf16 %v1530_v33  ;;  %v1271_v43 = vadd.f32 %v3525_v45, %v3575_v6 }
 0x227   : > { %v1641_v24 = vmul.f32 %v1577_v17, %v1438_v19  ;;  %v1531_v17 = vld [vmem:[%s3429_s20 + $0xa8] sm:$0xff] }
 0x228   : > { %v1686_v27 = vpack.c.bf16 %v1640_v34, %v1638_v21  ;;  %v1263_v21 = vadd.f32 %v3519_v42, %v3568_v3  ;;  %v1585_v26 = vunpack.c.h.bf16 %v1531_v17 }
 0x229   : > { %v1441_v28 = vpop.f32.mrb[36].mxu0  ;;  %v1687_v29 = vpack.c.bf16 %v1641_v24, %v1639_v23  ;;  %v1584_v24 = vunpack.c.l.bf16 %v1531_v17 }
 0x22a   : > { %v1442_v31 = vadd.f32 %v1441_v28, %v1249_v22  ;;  %v1443_v63 = vpop.f32.mrb[37].mxu0  ;;  %v1582_v22 = vunpack.c.l.bf16 %v1530_v33 }
 0x22b   : > { %v1444_v7 = vadd.f32 %v1443_v63, %v1251_v35  ;;  %v1445_v37 = vpop.f32.mrb[38].mxu0  ;;  %2018 = vmatprep.mubr.bf16.mxu1 %v1687_v29 }
 0x22c   : > { %v1446_v11 = vadd.f32 %v1445_v37, %v1253_v30  ;;  %v1447_v12 = vpop.f32.mrb[39].mxu0  ;;  %2019 = vmatmul.mubr.bf16.gmra.mrb[64].mxu1 %v1686_v27  ;;  %v1642_v14 = vmul.f32 %v1578_v56, %v1442_v31  ;;  %v1269_v31 = vadd.f32 %v3523_v44, %v3568_v3  ;;  %v1275_v44 = vadd.f32 %v3529_v47, %v3575_v6 }
 0x22d   : > { %v1448_v13 = vadd.f32 %v1447_v12, %v1255_v36  ;;  %v1643_v15 = vmul.f32 %v1579_v9, %v1444_v7  ;;  %v1533_v36 = vld [vmem:[%s3429_s20 + $0xb8] sm:$0xff]  ;;  %v1281_v47 = vadd.f32 %v3533_v49, %v3575_v6 }
 0x22e   : > { %v1644_v38 = vmul.f32 %v1580_v5, %v1446_v11  ;;  %v1532_v5 = vld [vmem:[%s3429_s20 + $0xb0] sm:$0xff] }
 0x22f   : > { %v1645_v16 = vmul.f32 %v1581_v10, %v1448_v13  ;;  %v1273_v10 = vadd.f32 %v3527_v46, %v3568_v3  ;;  %v1586_v12 = vunpack.c.l.bf16 %v1532_v5 }
 0x230   : > { %v1688_v18 = vpack.c.bf16 %v1644_v38, %v1642_v14  ;;  %v1588_v14 = vunpack.c.l.bf16 %v1533_v36 }
 0x231   : > { %v1451_v20 = vpop.f32.mrb[40].mxu0  ;;  %v1689_v19 = vpack.c.bf16 %v1645_v16, %v1643_v15  ;;  %v1589_v15 = vunpack.c.h.bf16 %v1533_v36  ;;  %v1536_v36 = vld [vmem:[%s3429_s20 + $0xd0] sm:$0xff] }
 0x232   : > { %v1452_v34 = vadd.f32 %v1451_v20, %v1259_v32  ;;  %v1453_v23 = vpop.f32.mrb[41].mxu0  ;;  %v1587_v32 = vunpack.c.h.bf16 %v1532_v5 }
 0x233   : > { %v1454_v35 = vadd.f32 %v1453_v23, %v1261_v39  ;;  %v1455_v41 = vpop.f32.mrb[42].mxu0  ;;  %2028 = vmatprep.mubr.bf16.mxu1 %v1689_v19 }
 0x234   : > { %v1456_v27 = vadd.f32 %v1455_v41, %v1263_v21  ;;  %v1457_v28 = vpop.f32.mrb[43].mxu0  ;;  %2029 = vmatmul.mubr.bf16.gmra.mrb[68].mxu1 %v1688_v18  ;;  %v1646_v30 = vmul.f32 %v1582_v22, %v1452_v34  ;;  %v1279_v18 = vadd.f32 %v3531_v48, %v3568_v3  ;;  %v1534_v21 = vld [vmem:[%s3429_s20 + $0xc0] sm:$0xff]  ;;  %v1535_v34 = vld [vmem:[%s3429_s20 + $0xc8] sm:$0xff]  ;;  %v1285_v48 = vadd.f32 %v3537_v51, %v3575_v6 }
 0x235   : > { %v1458_v29 = vadd.f32 %v1457_v28, %v1265_v40  ;;  %v1647_v56 = vmul.f32 %v1583_v25, %v1454_v35  ;;  %v1283_v40 = vadd.f32 %v3535_v50, %v3568_v3  ;;  %v1590_v25 = vunpack.c.l.bf16 %v1534_v21 }
 0x236   : > { %v1648_v42 = vmul.f32 %v1584_v24, %v1456_v27  ;;  %v1591_v28 = vunpack.c.h.bf16 %v1534_v21  ;;  %v1291_v51 = vadd.f32 %v3541_v53, %v3575_v6 }
 0x237   : > { %v1649_v63 = vmul.f32 %v1585_v26, %v1458_v29  ;;  %v1592_v26 = vunpack.c.l.bf16 %v1535_v34  ;;  %v1593_v29 = vunpack.c.h.bf16 %v1535_v34 }
 0x238   : > { %v1690_v7 = vpack.c.bf16 %v1648_v42, %v1646_v30 }
 0x239   : > { %v1461_v9 = vpop.f32.mrb[44].mxu0  ;;  %v1691_v37 = vpack.c.bf16 %v1649_v63, %v1647_v56  ;;  %v1289_v63 = vadd.f32 %v3539_v52, %v3568_v3  ;;  %v1295_v52 = vadd.f32 %v3545_v55, %v3575_v6  ;;  %v1301_v55 = vadd.f32 %v3549_v58, %v3575_v6 }
 0x23a   : > { %v1462_v11 = vadd.f32 %v1461_v9, %v1269_v31  ;;  %v1463_v13 = vpop.f32.mrb[45].mxu0 }
 0x23b   : > { %v1464_v38 = vadd.f32 %v1463_v13, %v1271_v43  ;;  %v1465_v45 = vpop.f32.mrb[46].mxu0  ;;  %2038 = vmatprep.mubr.bf16.mxu1 %v1691_v37  ;;  %v1594_v13 = vunpack.c.l.bf16 %v1536_v36 }
 0x23c   : > { %v1466_v16 = vadd.f32 %v1465_v45, %v1273_v10  ;;  %v1467_v39 = vpop.f32.mrb[47].mxu0  ;;  %2039 = vmatmul.mubr.bf16.gmra.mrb[72].mxu1 %v1690_v7  ;;  %v1650_v17 = vmul.f32 %v1586_v12, %v1462_v11  ;;  %v1537_v7 = vld [vmem:[%s3429_s20 + $0xd8] sm:$0xff]  ;;  %v1293_v11 = vadd.f32 %v3543_v54, %v3568_v3 }
 0x23d   : > { %v1468_v33 = vadd.f32 %v1467_v39, %v1275_v44  ;;  %v1651_v20 = vmul.f32 %v1587_v32, %v1464_v38  ;;  %v1596_v44 = vunpack.c.l.bf16 %v1537_v7  ;;  %v1595_v32 = vunpack.c.h.bf16 %v1536_v36 }
 0x23e   : > { %v1652_v46 = vmul.f32 %v1588_v14, %v1466_v16  ;;  %v1597_v45 = vunpack.c.h.bf16 %v1537_v7 }
 0x23f   : > { %v1653_v19 = vmul.f32 %v1589_v15, %v1468_v33 }
 0x240   : > { %v1692_v22 = vpack.c.bf16 %v1652_v46, %v1650_v17  ;;  %v1299_v17 = vadd.f32 %v3547_v57, %v3568_v3  ;;  %v1305_v57 = vadd.f32 %v3555_v61, %v3575_v6  ;;  %v1311_v61 = vadd.f32 %v3564_v2, %v3575_v6 }
 0x241   : > { %v1471_v23 = vpop.f32.mrb[48].mxu0  ;;  %v1693_v24 = vpack.c.bf16 %v1653_v19, %v1651_v20  ;;  %v1538_v20 = vld [vmem:[%s3429_s20 + $0xe0] sm:$0xff]  ;;  %v1539_v19 = vld [vmem:[%s3429_s20 + $0xe8] sm:$0xff] }
 0x242   : > { %v1472_v35 = vadd.f32 %v1471_v23, %v1279_v18  ;;  %v1473_v41 = vpop.f32.mrb[49].mxu0 }
 0x243   : > { %v1474_v27 = vadd.f32 %v1473_v41, %v1281_v47  ;;  %v1475_v49 = vpop.f32.mrb[50].mxu0  ;;  %2048 = vmatprep.mubr.bf16.mxu1 %v1693_v24  ;;  %v1598_v24 = vunpack.c.l.bf16 %v1538_v20  ;;  %v1599_v41 = vunpack.c.h.bf16 %v1538_v20 }
 0x244   : > { %v1476_v30 = vadd.f32 %v1475_v49, %v1283_v40  ;;  %v1477_v42 = vpop.f32.mrb[51].mxu0  ;;  %2049 = vmatmul.mubr.bf16.gmra.mrb[76].mxu1 %v1692_v22  ;;  %v1654_v56 = vmul.f32 %v1590_v25, %v1472_v35  ;;  %v1303_v22 = vadd.f32 %v3553_v60, %v3568_v3  ;;  %v1600_v35 = vunpack.c.l.bf16 %v1539_v19 }
 0x245   : > { %v1478_v31 = vadd.f32 %v1477_v42, %v1285_v48  ;;  %v1655_v43 = vmul.f32 %v1591_v28, %v1474_v27 }
 0x246   : > { %v1656_v50 = vmul.f32 %v1592_v26, %v1476_v30  ;;  %v1601_v26 = vunpack.c.h.bf16 %v1539_v19 }
 0x247   : > { %v1657_v5 = vmul.f32 %v1593_v29, %v1478_v31  ;;  %v1309_v29 = vadd.f32 %v3562_v1, %v3568_v3  ;;  %v1540_v31 = vld [vmem:[%s3429_s20 + $0xf0] sm:$0xff]  ;;  %v1315_v1 = vadd.f32 %v3578_v8, %v3575_v6  ;;  %v1734_v6 = vld [vmem:[%s3904_s4] sm:$0x3] }
 0x248   : > { %v1694_v9 = vpack.c.bf16 %v1656_v50, %v1654_v56  ;;  %v1541_v56 = vld [vmem:[%s3429_s20 + $0xf8] sm:$0xff]  ;;  %v1602_v36 = vunpack.c.l.bf16 %v1540_v31  ;;  %v3711_v8 = vrot.slane %v1734_v6, %v476_v62 }
 0x249   : > { %v1481_v37 = vpop.f32.mrb[52].mxu0  ;;  %v1695_v10 = vpack.c.bf16 %v1657_v5, %v1655_v43  ;;  %v1313_v5 = vadd.f32 %v3570_v4, %v3568_v3  ;;  %v1605_v2 = vunpack.c.h.bf16 %v1541_v56 }
 0x24a   : > { %v1482_v12 = vadd.f32 %v1481_v37, %v1289_v63  ;;  %v1483_v14 = vpop.f32.mrb[53].mxu0 }
 0x24b   : > { %v1484_v38 = vadd.f32 %v1483_v14, %v1291_v51  ;;  %v1485_v53 = vpop.f32.mrb[54].mxu0  ;;  %2058 = vmatprep.mubr.bf16.mxu1 %v1695_v10  ;;  %v1603_v10 = vunpack.c.h.bf16 %v1540_v31 }
 0x24c   : > { %v1486_v15 = vadd.f32 %v1485_v53, %v1293_v11  ;;  %v1487_v16 = vpop.f32.mrb[55].mxu0  ;;  %2059 = vmatmul.mubr.bf16.gmra.mrb[80].mxu1 %v1694_v9  ;;  %v1658_v33 = vmul.f32 %v1594_v13, %v1482_v12  ;;  %v1604_v9 = vunpack.c.l.bf16 %v1541_v56  ;;  %v3715_v53 = vrot.slane %v1734_v6, %v480_v0 }
 0x24d   : > { %v1488_v39 = vadd.f32 %v1487_v16, %v1295_v52  ;;  %v1659_v46 = vmul.f32 %v1595_v32, %v1484_v38 }
 0x24e   : > { %v1660_v54 = vmul.f32 %v1596_v44, %v1486_v15 }
 0x24f   : > { %v1661_v18 = vmul.f32 %v1597_v45, %v1488_v39 }
 0x250   : > { %v1696_v47 = vpack.c.bf16 %v1660_v54, %v1658_v33 }
 0x251   : > { %v1491_v21 = vpop.f32.mrb[56].mxu0  ;;  %v1697_v34 = vpack.c.bf16 %v1661_v18, %v1659_v46 }
 0x252   : > { %v1492_v23 = vadd.f32 %v1491_v21, %v1299_v17  ;;  %v1493_v40 = vpop.f32.mrb[57].mxu0 }
 0x253   : > { %v1494_v25 = vadd.f32 %v1493_v40, %v1301_v55  ;;  %v1495_v58 = vpop.f32.mrb[58].mxu0  ;;  %2068 = vmatprep.mubr.bf16.mxu1 %v1697_v34 }
 0x254   : > { %v1496_v48 = vadd.f32 %v1495_v58, %v1303_v22  ;;  %v1497_v27 = vpop.f32.mrb[59].mxu0  ;;  %2069 = vmatmul.mubr.bf16.gmra.mrb[84].mxu1 %v1696_v47  ;;  %v1662_v49 = vmul.f32 %v1598_v24, %v1492_v23 }
 0x255   : > { %v1498_v28 = vadd.f32 %v1497_v27, %v1305_v57  ;;  %v1663_v30 = vmul.f32 %v1599_v41, %v1494_v25 }
 0x256   : > { %v1664_v60 = vmul.f32 %v1600_v35, %v1496_v48 }
 0x257   : > { %v1665_v42 = vmul.f32 %v1601_v26, %v1498_v28 }
 0x258   : > { %v1698_v50 = vpack.c.bf16 %v1664_v60, %v1662_v49 }
 0x259   : > { %v1501_v63 = vpop.f32.mrb[60].mxu0  ;;  %v1699_v43 = vpack.c.bf16 %v1665_v42, %v1663_v30 }
 0x25a   : > { %v1502_v51 = vadd.f32 %v1501_v63, %v1309_v29  ;;  %v1503_v7 = vpop.f32.mrb[61].mxu0 }
 0x25b   : > { %v1504_v37 = vadd.f32 %v1503_v7, %v1311_v61  ;;  %v1505_v11 = vpop.f32.mrb[62].mxu0  ;;  %2078 = vmatprep.mubr.bf16.mxu1 %v1699_v43 }
 0x25c   : > { %v1506_v12 = vadd.f32 %v1505_v11, %v1313_v5  ;;  %v1507_v13 = vpop.f32.mrb[63].mxu0  ;;  %2079 = vmatmul.mubr.bf16.gmra.mrb[88].mxu1 %v1698_v50  ;;  %v1666_v44 = vmul.f32 %v1602_v36, %v1502_v51 }
 0x25d   : > { %v1508_v14 = vadd.f32 %v1507_v13, %v1315_v1  ;;  %v1667_v3 = vmul.f32 %v1603_v10, %v1504_v37 }
 0x25e   : > { %v1668_v52 = vmul.f32 %v1604_v9, %v1506_v12 }
 0x25f   : > { %v1669_v4 = vmul.f32 %v1605_v2, %v1508_v14 }
 0x260   : > { %v1700_v38 = vpack.c.bf16 %v1668_v52, %v1666_v44 }
 0x261   : > { %v1701_v32 = vpack.c.bf16 %v1669_v4, %v1667_v3 }
 0x263   : > { %2088 = vmatprep.mubr.bf16.mxu1 %v1701_v32 }
 0x264   : > { %2089 = vmatmul.mubr.bf16.gmra.mrb[92].mxu1 %v1700_v38 }
 0x2bf   : > { %v1940_v45 = vpop.f32.mrb[32].mxu1 }
 0x2c0   : > { %v1941_v15 = vadd.f32 %v1940_v45, %v3711_v8  ;;  %v1942_v16 = vpop.f32.mrb[33].mxu1 }
 0x2c1   : > { %v1943_v39 = vadd.f32 %v1942_v16, %v3715_v53  ;;  %v1944_v33 = vpop.f32.mrb[34].mxu1 }
 0x2c2   : > { %2099 = vst [vmem:[%s3721_s30] sm:$0xff] %v1941_v15  ;;  %v1945_v59 = vadd.f32 %v1944_v33, %v3711_v8  ;;  %v1946_v62 = vpop.f32.mrb[35].mxu1 }
 0x2c3   : > { %2100 = vst [vmem:[%s3721_s30 + $0x8] sm:$0xff] %v1943_v39  ;;  %v1947_v0 = vadd.f32 %v1946_v62, %v3715_v53 }
 0x2c4   : > { %2101 = vst [vmem:[%s3721_s30 + $0x10] sm:$0xff] %v1945_v59 }
 0x2c5   : > { %2102 = vst [vmem:[%s3721_s30 + $0x18] sm:$0xff] %v1947_v0 }
 0x2c7   : > { %v1950_v54 = vpop.f32.mrb[36].mxu1 }
 0x2c8   : > { %v1951_v17 = vadd.f32 %v1950_v54, %v3711_v8  ;;  %v1952_v46 = vpop.f32.mrb[37].mxu1 }
 0x2c9   : > { %v1953_v18 = vadd.f32 %v1952_v46, %v3715_v53  ;;  %v1954_v55 = vpop.f32.mrb[38].mxu1 }
 0x2ca   : > { %2103 = vst [vmem:[%s3721_s30 + $0x20] sm:$0xff] %v1951_v17  ;;  %v1955_v20 = vadd.f32 %v1954_v55, %v3711_v8  ;;  %v1956_v19 = vpop.f32.mrb[39].mxu1 }
 0x2cb   : > { %2104 = vst [vmem:[%s3721_s30 + $0x28] sm:$0xff] %v1953_v18  ;;  %v1957_v47 = vadd.f32 %v1956_v19, %v3715_v53 }
 0x2cc   : > { %2105 = vst [vmem:[%s3721_s30 + $0x30] sm:$0xff] %v1955_v20 }
 0x2cd   : > { %2106 = vst [vmem:[%s3721_s30 + $0x38] sm:$0xff] %v1957_v47 }
 0x2cf   : > { %v1960_v21 = vpop.f32.mrb[40].mxu1 }
 0x2d0   : > { %v1961_v34 = vadd.f32 %v1960_v21, %v3711_v8  ;;  %v1962_v22 = vpop.f32.mrb[41].mxu1 }
 0x2d1   : > { %v1963_v23 = vadd.f32 %v1962_v22, %v3715_v53  ;;  %v1964_v24 = vpop.f32.mrb[42].mxu1 }
 0x2d2   : > { %2107 = vst [vmem:[%s3721_s30 + $0x40] sm:$0xff] %v1961_v34  ;;  %v1965_v40 = vadd.f32 %v1964_v24, %v3711_v8  ;;  %v1966_v35 = vpop.f32.mrb[43].mxu1 }
 0x2d3   : > { %2108 = vst [vmem:[%s3721_s30 + $0x48] sm:$0xff] %v1963_v23  ;;  %v1967_v57 = vadd.f32 %v1966_v35, %v3715_v53 }
 0x2d4   : > { %2109 = vst [vmem:[%s3721_s30 + $0x50] sm:$0xff] %v1965_v40 }
 0x2d5   : > { %2110 = vst [vmem:[%s3721_s30 + $0x58] sm:$0xff] %v1967_v57 }
 0x2d7   : > { %v1970_v25 = vpop.f32.mrb[44].mxu1 }
 0x2d8   : > { %v1971_v41 = vadd.f32 %v1970_v25, %v3711_v8  ;;  %v1972_v58 = vpop.f32.mrb[45].mxu1 }
 0x2d9   : > { %v1973_v26 = vadd.f32 %v1972_v58, %v3715_v53  ;;  %v1974_v48 = vpop.f32.mrb[46].mxu1 }
 0x2da   : > { %2111 = vst [vmem:[%s3721_s30 + $0x60] sm:$0xff] %v1971_v41  ;;  %v1975_v27 = vadd.f32 %v1974_v48, %v3711_v8  ;;  %v1976_v28 = vpop.f32.mrb[47].mxu1 }
 0x2db   : > { %2112 = vst [vmem:[%s3721_s30 + $0x68] sm:$0xff] %v1973_v26  ;;  %v1977_v49 = vadd.f32 %v1976_v28, %v3715_v53 }
 0x2dc   : > { %2113 = vst [vmem:[%s3721_s30 + $0x70] sm:$0xff] %v1975_v27 }
 0x2dd   : > { %2114 = vst [vmem:[%s3721_s30 + $0x78] sm:$0xff] %v1977_v49 }
 0x2df   : > { %v1980_v60 = vpop.f32.mrb[48].mxu1 }
 0x2e0   : > { %v1981_v29 = vadd.f32 %v1980_v60, %v3711_v8  ;;  %v1982_v30 = vpop.f32.mrb[49].mxu1 }
 0x2e1   : > { %v1983_v42 = vadd.f32 %v1982_v30, %v3715_v53  ;;  %v1984_v61 = vpop.f32.mrb[50].mxu1 }
 0x2e2   : > { %2115 = vst [vmem:[%s3721_s30 + $0x80] sm:$0xff] %v1981_v29  ;;  %v1985_v31 = vadd.f32 %v1984_v61, %v3711_v8  ;;  %v1986_v56 = vpop.f32.mrb[51].mxu1 }
 0x2e3   : > { %2116 = vst [vmem:[%s3721_s30 + $0x88] sm:$0xff] %v1983_v42  ;;  %v1987_v50 = vadd.f32 %v1986_v56, %v3715_v53 }
 0x2e4   : > { %2117 = vst [vmem:[%s3721_s30 + $0x90] sm:$0xff] %v1985_v31 }
 0x2e5   : > { %2118 = vst [vmem:[%s3721_s30 + $0x98] sm:$0xff] %v1987_v50 }
 0x2e7   : > { %v1990_v63 = vpop.f32.mrb[52].mxu1 }
 0x2e8   : > { %v1991_v43 = vadd.f32 %v1990_v63, %v3711_v8  ;;  %v1992_v5 = vpop.f32.mrb[53].mxu1 }
 0x2e9   : > { %v1993_v51 = vadd.f32 %v1992_v5, %v3715_v53  ;;  %v1994_v36 = vpop.f32.mrb[54].mxu1 }
 0x2ea   : > { %2119 = vst [vmem:[%s3721_s30 + $0xa0] sm:$0xff] %v1991_v43  ;;  %v1995_v7 = vadd.f32 %v1994_v36, %v3711_v8  ;;  %v1996_v9 = vpop.f32.mrb[55].mxu1 }
 0x2eb   : > { %2120 = vst [vmem:[%s3721_s30 + $0xa8] sm:$0xff] %v1993_v51  ;;  %v1997_v1 = vadd.f32 %v1996_v9, %v3715_v53 }
 0x2ec   : > { %2121 = vst [vmem:[%s3721_s30 + $0xb0] sm:$0xff] %v1995_v7 }
 0x2ed   : > { %2122 = vst [vmem:[%s3721_s30 + $0xb8] sm:$0xff] %v1997_v1 }
 0x2ef   : > { %v2000_v37 = vpop.f32.mrb[56].mxu1 }
 0x2f0   : > { %v2001_v10 = vadd.f32 %v2000_v37, %v3711_v8  ;;  %v2002_v11 = vpop.f32.mrb[57].mxu1 }
 0x2f1   : > { %v2003_v2 = vadd.f32 %v2002_v11, %v3715_v53  ;;  %v2004_v12 = vpop.f32.mrb[58].mxu1 }
 0x2f2   : > { %2123 = vst [vmem:[%s3721_s30 + $0xc0] sm:$0xff] %v2001_v10  ;;  %v2005_v13 = vadd.f32 %v2004_v12, %v3711_v8  ;;  %v2006_v14 = vpop.f32.mrb[59].mxu1 }
 0x2f3   : > { %2124 = vst [vmem:[%s3721_s30 + $0xc8] sm:$0xff] %v2003_v2  ;;  %v2007_v44 = vadd.f32 %v2006_v14, %v3715_v53 }
 0x2f4   : > { %2125 = vst [vmem:[%s3721_s30 + $0xd0] sm:$0xff] %v2005_v13 }
 0x2f5   : > { %2126 = vst [vmem:[%s3721_s30 + $0xd8] sm:$0xff] %v2007_v44 }
 0x2f7   : > { %v2010_v52 = vpop.f32.mrb[60].mxu1 }
 0x2f8   : > { %v2011_v3 = vadd.f32 %v2010_v52, %v3711_v8  ;;  %v2012_v4 = vpop.f32.mrb[61].mxu1 }
 0x2f9   : > { %v2013_v38 = vadd.f32 %v2012_v4, %v3715_v53  ;;  %v2014_v32 = vpop.f32.mrb[62].mxu1 }
 0x2fa   : > { %2127 = vst [vmem:[%s3721_s30 + $0xe0] sm:$0xff] %v2011_v3  ;;  %v2015_v6 = vadd.f32 %v2014_v32, %v3711_v8  ;;  %v2016_v45 = vpop.f32.mrb[63].mxu1 }
 0x2fb   : > { %2128 = vst [vmem:[%s3721_s30 + $0xe8] sm:$0xff] %v2013_v38  ;;  %v2017_v15 = vadd.f32 %v2016_v45, %v3715_v53 }
 0x2fc   : > { %2129 = vst [vmem:[%s3721_s30 + $0xf0] sm:$0xff] %v2015_v6 }
 0x2fd   : > { %2130 = vst [vmem:[%s3721_s30 + $0xf8] sm:$0xff] %v2017_v15 }
 0x2ff   : > { %v2020_v16 = vpop.f32.mrb[64].mxu1 }
 0x300   : > { %v2021_v39 = vadd.f32 %v2020_v16, %v3711_v8  ;;  %v2022_v33 = vpop.f32.mrb[65].mxu1 }
 0x301   : > { %v2023_v59 = vadd.f32 %v2022_v33, %v3715_v53  ;;  %v2024_v62 = vpop.f32.mrb[66].mxu1 }
 0x302   : > { %2131 = vst [vmem:[%s3721_s30 + $0x100] sm:$0xff] %v2021_v39  ;;  %v2025_v0 = vadd.f32 %v2024_v62, %v3711_v8  ;;  %v2026_v54 = vpop.f32.mrb[67].mxu1 }
 0x303   : > { %2132 = vst [vmem:[%s3721_s30 + $0x108] sm:$0xff] %v2023_v59  ;;  %v2027_v17 = vadd.f32 %v2026_v54, %v3715_v53 }
 0x304   : > { %2133 = vst [vmem:[%s3721_s30 + $0x110] sm:$0xff] %v2025_v0 }
 0x305   : > { %2134 = vst [vmem:[%s3721_s30 + $0x118] sm:$0xff] %v2027_v17 }
 0x307   : > { %v2030_v46 = vpop.f32.mrb[68].mxu1 }
 0x308   : > { %v2031_v18 = vadd.f32 %v2030_v46, %v3711_v8  ;;  %v2032_v55 = vpop.f32.mrb[69].mxu1 }
 0x309   : > { %v2033_v20 = vadd.f32 %v2032_v55, %v3715_v53  ;;  %v2034_v19 = vpop.f32.mrb[70].mxu1 }
 0x30a   : > { %2135 = vst [vmem:[%s3721_s30 + $0x120] sm:$0xff] %v2031_v18  ;;  %v2035_v47 = vadd.f32 %v2034_v19, %v3711_v8  ;;  %v2036_v21 = vpop.f32.mrb[71].mxu1 }
 0x30b   : > { %2136 = vst [vmem:[%s3721_s30 + $0x128] sm:$0xff] %v2033_v20  ;;  %v2037_v34 = vadd.f32 %v2036_v21, %v3715_v53 }
 0x30c   : > { %2137 = vst [vmem:[%s3721_s30 + $0x130] sm:$0xff] %v2035_v47 }
 0x30d   : > { %2138 = vst [vmem:[%s3721_s30 + $0x138] sm:$0xff] %v2037_v34 }
 0x30f   : > { %v2040_v22 = vpop.f32.mrb[72].mxu1 }
 0x310   : > { %v2041_v23 = vadd.f32 %v2040_v22, %v3711_v8  ;;  %v2042_v24 = vpop.f32.mrb[73].mxu1 }
 0x311   : > { %v2043_v40 = vadd.f32 %v2042_v24, %v3715_v53  ;;  %v2044_v35 = vpop.f32.mrb[74].mxu1 }
 0x312   : > { %2139 = vst [vmem:[%s3721_s30 + $0x140] sm:$0xff] %v2041_v23  ;;  %v2045_v57 = vadd.f32 %v2044_v35, %v3711_v8  ;;  %v2046_v25 = vpop.f32.mrb[75].mxu1 }
 0x313   : > { %2140 = vst [vmem:[%s3721_s30 + $0x148] sm:$0xff] %v2043_v40  ;;  %v2047_v41 = vadd.f32 %v2046_v25, %v3715_v53 }
 0x314   : > { %2141 = vst [vmem:[%s3721_s30 + $0x150] sm:$0xff] %v2045_v57 }
 0x315   : > { %2142 = vst [vmem:[%s3721_s30 + $0x158] sm:$0xff] %v2047_v41 }
 0x317   : > { %v2050_v58 = vpop.f32.mrb[76].mxu1 }
 0x318   : > { %v2051_v26 = vadd.f32 %v2050_v58, %v3711_v8  ;;  %v2052_v48 = vpop.f32.mrb[77].mxu1 }
 0x319   : > { %v2053_v27 = vadd.f32 %v2052_v48, %v3715_v53  ;;  %v2054_v28 = vpop.f32.mrb[78].mxu1 }
 0x31a   : > { %2143 = vst [vmem:[%s3721_s30 + $0x160] sm:$0xff] %v2051_v26  ;;  %v2055_v49 = vadd.f32 %v2054_v28, %v3711_v8  ;;  %v2056_v60 = vpop.f32.mrb[79].mxu1 }
 0x31b   : > { %2144 = vst [vmem:[%s3721_s30 + $0x168] sm:$0xff] %v2053_v27  ;;  %v2057_v29 = vadd.f32 %v2056_v60, %v3715_v53 }
 0x31c   : > { %2145 = vst [vmem:[%s3721_s30 + $0x170] sm:$0xff] %v2055_v49 }
 0x31d   : > { %2146 = vst [vmem:[%s3721_s30 + $0x178] sm:$0xff] %v2057_v29 }
 0x31f   : > { %v2060_v30 = vpop.f32.mrb[80].mxu1 }
 0x320   : > { %v2061_v42 = vadd.f32 %v2060_v30, %v3711_v8  ;;  %v2062_v61 = vpop.f32.mrb[81].mxu1 }
 0x321   : > { %v2063_v31 = vadd.f32 %v2062_v61, %v3715_v53  ;;  %v2064_v56 = vpop.f32.mrb[82].mxu1 }
 0x322   : > { %2147 = vst [vmem:[%s3721_s30 + $0x180] sm:$0xff] %v2061_v42  ;;  %v2065_v50 = vadd.f32 %v2064_v56, %v3711_v8  ;;  %v2066_v63 = vpop.f32.mrb[83].mxu1 }
 0x323   : > { %2148 = vst [vmem:[%s3721_s30 + $0x188] sm:$0xff] %v2063_v31  ;;  %v2067_v43 = vadd.f32 %v2066_v63, %v3715_v53 }
 0x324   : > { %2149 = vst [vmem:[%s3721_s30 + $0x190] sm:$0xff] %v2065_v50 }
 0x325   : > { %2150 = vst [vmem:[%s3721_s30 + $0x198] sm:$0xff] %v2067_v43 }
 0x327   : > { %v2070_v5 = vpop.f32.mrb[84].mxu1 }
 0x328   : > { %v2071_v51 = vadd.f32 %v2070_v5, %v3711_v8  ;;  %v2072_v36 = vpop.f32.mrb[85].mxu1 }
 0x329   : > { %v2073_v7 = vadd.f32 %v2072_v36, %v3715_v53  ;;  %v2074_v9 = vpop.f32.mrb[86].mxu1 }
 0x32a   : > { %2151 = vst [vmem:[%s3721_s30 + $0x1a0] sm:$0xff] %v2071_v51  ;;  %v2075_v1 = vadd.f32 %v2074_v9, %v3711_v8  ;;  %v2076_v37 = vpop.f32.mrb[87].mxu1 }
 0x32b   : > { %2152 = vst [vmem:[%s3721_s30 + $0x1a8] sm:$0xff] %v2073_v7  ;;  %v2077_v10 = vadd.f32 %v2076_v37, %v3715_v53 }
 0x32c   : > { %2153 = vst [vmem:[%s3721_s30 + $0x1b0] sm:$0xff] %v2075_v1 }
 0x32d   : > { %2154 = vst [vmem:[%s3721_s30 + $0x1b8] sm:$0xff] %v2077_v10 }
 0x32f   : > { %v2080_v11 = vpop.f32.mrb[88].mxu1 }
 0x330   : > { %v2081_v2 = vadd.f32 %v2080_v11, %v3711_v8  ;;  %v2082_v12 = vpop.f32.mrb[89].mxu1 }
 0x331   : > { %v2083_v13 = vadd.f32 %v2082_v12, %v3715_v53  ;;  %v2084_v14 = vpop.f32.mrb[90].mxu1 }
 0x332   : > { %2155 = vst [vmem:[%s3721_s30 + $0x1c0] sm:$0xff] %v2081_v2  ;;  %v2085_v44 = vadd.f32 %v2084_v14, %v3711_v8  ;;  %v2086_v52 = vpop.f32.mrb[91].mxu1 }
 0x333   : > { %2156 = vst [vmem:[%s3721_s30 + $0x1c8] sm:$0xff] %v2083_v13  ;;  %v2087_v3 = vadd.f32 %v2086_v52, %v3715_v53 }
 0x334   : > { %2157 = vst [vmem:[%s3721_s30 + $0x1d0] sm:$0xff] %v2085_v44 }
 0x335   : > { %2158 = vst [vmem:[%s3721_s30 + $0x1d8] sm:$0xff] %v2087_v3 }
 0x337   : > { %v2090_v4 = vpop.f32.mrb[92].mxu1 }
 0x338   : > { %v2091_v38 = vadd.f32 %v2090_v4, %v3711_v8  ;;  %v2092_v32 = vpop.f32.mrb[93].mxu1 }
 0x339   : > { %v2093_v6 = vadd.f32 %v2092_v32, %v3715_v53  ;;  %v2094_v45 = vpop.f32.mrb[94].mxu1 }
 0x33a   : > { %2159 = vst [vmem:[%s3721_s30 + $0x1e0] sm:$0xff] %v2091_v38  ;;  %v2095_v15 = vadd.f32 %v2094_v45, %v3711_v8  ;;  %v2096_v16 = vpop.f32.mrb[95].mxu1 }
 0x33b   : > { %2160 = vst [vmem:[%s3721_s30 + $0x1e8] sm:$0xff] %v2093_v6  ;;  %v2097_v39 = vadd.f32 %v2096_v16, %v3715_v53 }
 0x33c   : > { %2161 = vst [vmem:[%s3721_s30 + $0x1f0] sm:$0xff] %v2095_v15 }
 0x33d   : > { %2162 = vst [vmem:[%s3721_s30 + $0x1f8] sm:$0xff] %v2097_v39 }
 0x33e   : > { %3091 = shalt.err (!%p3088_p3)
}
 0x33f   : > { %s3092_s11 = scalar_lea.hbm %s3850_s17, 8192  ;;  %s3096_s8 = scalar_lea.hbm %s3906_s6, 16384 }
 0x340   : > { %p3093_p9 = scmp.ne.s32.totalorder %s3850_s17, %s3092_s11  ;;  %p3097_p7 = scmp.lt.u32.totalorder %s3850_s17, %s3906_s6 }
 0x341   : > { %p3098_p5 = scmp.lt.u32.totalorder %s3096_s8, %s3092_s11  ;;  %p3100_p8 = scmp.lt.u32.totalorder %s3092_s11, %s3850_s17 }
 0x342   : > { %p3094_p10 = pnand %p3093_p9, %p3934_p4 }
 0x343   : > { %p3099_p1 = por %p3098_p5, %p3097_p7 }
 0x344   : > { %p3095_p6 = pneg %p3094_p10 }
 0x345   : > { %p3101_p2 = por %p3100_p8, %p3099_p1 }
 0x347   : > { %p3102_p11 = pnand %p3101_p2, %p3095_p6 }
 0x349   : > { %3105 = shalt.err (!%p3102_p11)
}
 0x34a   : > { %s3163_s13 = smov 256   ;;  %s3164_s30 = smov 16  }
 0x34b   : > { %2656 = dma.vmem_to_hbm [thread:$0]  (%p3934_p4), %s3852_s10, 8192, %s3850_s17, %s2164_s25, %s3163_s13, %s3163_s13, %s3164_s30  }
 0x34c PF: > { %s3935_s7 = sld [smem:[#allocation17_spill]]  ;;  %s2193_s18 = sand.u32 1, %s3140_s21  }
 0x34d   : > { %p3937_p0 = scmp.ge.s32.totalorder %s3152_s24, 2  ;;  %s2194_s19 = scalar_lea.sflag [#allocation4], %s2193_s18 }
 0x352   : > { %p3936_p13 = scmp.ne.s32.totalorder %s3935_s7, 0 }
 0x354   : > { %p2673_p12 = pnand %p3937_p0, %p3936_p13 }
 0x356   : > { %3135 = dma.done.wait (!%p2673_p12), %s2194_s19, 8192  }
 0x357   : > { %3137 = vsyncadd (!%p2673_p12), %s2194_s19, 4294959104  ;;  %s3938_s24 = sld [smem:[#allocation15_spill]]  ;;  %s3939_s14 = sld [smem:[#allocation16_spill]] }
 0x358   : > { %s3940_s21 = smov %s3144_s22  ;;  %s3941_s22 = smov %s3148_s23 }
 0x35d   : > { %p23_p3 = scmp.ge.s32.totalorder %s3938_s24, 4   ;;  %s3942_s23 = smov %s3939_s14 }
 0x35f   :  { %25 = sbr.rel (!%p23_p3) target bundleno = 8 (0x8), region = 110 }
 0x366   :  { %2199 = vsyncpa [#allocation3], 1 }
 0x367   :  { %2201 = vsyncpa [#allocation3 + $0x1], 1 }
 0x368   :  { %2202 = vsyncpa [#allocation6], 1 }
 0x369   :  { %2203 = vsyncpa [#allocation9], 1 }
 0x36a   :  { %2205 = vsyncpa [#allocation9 + $0x1], 1 }
 0x36b   :  { %2206 = vsyncpa [#allocation4], 1 }
 0x36c   :  { %2208 = vsyncpa [#allocation4 + $0x1], 1 }

</bundles_post_ra>
